<compile_context>
chip_gen: v6e
topology: v6e:2x2x1
jax: 0.10.0
libtpu: 0.0.40
codegen_flags: <defaults>
</compile_context>

<pallas_src>
import functools
import math

import jax
import jax.numpy as jnp
from jax import lax
from jax.experimental import pallas as pl
from jax.experimental.pallas import tpu as pltpu


# For production shapes set this to jnp.bfloat16: bf16 MXU peak on v5e/v6e/v7x
# and half the resident weight / K-V cache VMEM footprint (accumulation stays
# f32 via preferred_element_type).  If flipped, loosen the self-check tolerance.
MATMUL_DTYPE = jnp.float32


def _local_attn_kernel(
    x_q_ref,    # (TQ, D)  query rows of x for this tile (squeezed)
    x_kv_ref,   # (S, D)   full-sequence rows of x (resident across q tiles)
    wq_ref,     # (D, D)   weights / biases: resident in VMEM across steps
    bq_ref,     # (1, D)
    wk_ref, bk_ref,
    wv_ref, bv_ref,
    wo_ref,     # (D, D)
    bo_ref,     # (1, D)
    gamma_ref,  # (1, D)
    beta_ref,   # (1, D)
    o_ref,      # (TQ, D)
    k_cache,    # (S, D)  VMEM scratch — persists across grid steps
    v_cache,    # (S, D)  VMEM scratch
    attn_buf,   # (TQ, D) f32 VMEM scratch — per-head outputs (replaces concat)
    *,
    num_heads,
    head_dim,
    window_size,
):
    qi = pl.program_id(1)
    tq, d_model = x_q_ref.shape
    seq_len = x_kv_ref.shape[0]

    # ---- K/V projections: once per batch element, cached across query tiles.
    #      Fused (S, D) x (D, D) keeps the MXU lane-dense (vs per-head slabs).
    @pl.when(qi == 0)
    def _():
        xf = x_kv_ref[...].astype(MATMUL_DTYPE)            # cast hoisted (once)
        k = jnp.dot(xf, wk_ref[...].astype(MATMUL_DTYPE),
                    preferred_element_type=jnp.float32) + bk_ref[...]
        v = jnp.dot(xf, wv_ref[...].astype(MATMUL_DTYPE),
                    preferred_element_type=jnp.float32) + bv_ref[...]
        k_cache[...] = k.astype(k_cache.dtype)
        v_cache[...] = v.astype(v_cache.dtype)

    x_q = x_q_ref[...].astype(jnp.float32)                 # (TQ, D)
    x_q_mm = x_q.astype(MATMUL_DTYPE)                      # hoisted cast

    # Q projection for this tile; 1/sqrt(head_dim) folded in here once
    # (TQ*D multiplies) instead of scaling each (TQ, S) score tile per head.
    scale = jnp.float32(1.0 / math.sqrt(head_dim))
    q = (jnp.dot(x_q_mm, wq_ref[...].astype(MATMUL_DTYPE),
                 preferred_element_type=jnp.float32) + bq_ref[...]) * scale

    # Banded local-window mask for this query tile (rows offset by qi * TQ).
    half = window_size // 2
    row = lax.broadcasted_iota(jnp.int32, (tq, seq_len), 0) + qi * tq
    col = lax.broadcasted_iota(jnp.int32, (tq, seq_len), 1)
    in_window = (col >= row - half) & (col <= row + half)
    neg_inf = jnp.float32(float("-inf"))

    kc = k_cache[...].astype(MATMUL_DTYPE)                 # (S, D), cast once
    vc = v_cache[...].astype(MATMUL_DTYPE)

    for h in range(num_heads):                             # static unroll
        lo = h * head_dim
        hi = lo + head_dim
        qh = q[:, lo:hi].astype(MATMUL_DTYPE)              # (TQ, Dh)
        kh = kc[:, lo:hi]                                  # (S, Dh)
        vh = vc[:, lo:hi]                                  # (S, Dh)

        # q @ k^T without materializing a transpose (contract last dims).
        s = lax.dot_general(
            qh, kh,
            dimension_numbers=(((1,), (1,)), ((), ())),
            preferred_element_type=jnp.float32,
        )                                                  # (TQ, S)
        s = jnp.where(in_window, s, neg_inf)

        # Softmax with deferred normalization: exp, P @ V, then rescale the
        # (TQ, Dh) result by an EUP reciprocal of the row sums.  The diagonal
        # is always in-window, so rows are never fully masked (no NaNs).
        m = jnp.max(s, axis=-1, keepdims=True)
        p = jnp.exp(s - m)
        denom = jnp.sum(p, axis=-1, keepdims=True)
        oh = jnp.dot(p.astype(MATMUL_DTYPE), vh,
                     preferred_element_type=jnp.float32)   # (TQ, Dh)
        attn_buf[:, lo:hi] = oh * pl.reciprocal(denom, approx=True)
        # (dropout on p is identity in eval mode)

    # Fused, lane-dense output projection from the preallocated head buffer.
    proj = jnp.dot(attn_buf[...].astype(MATMUL_DTYPE),
                   wo_ref[...].astype(MATMUL_DTYPE),
                   preferred_element_type=jnp.float32) + bo_ref[...]

    # Residual + LayerNorm (single-pass sum / sum-of-squares).
    r = x_q + proj
    inv_d = jnp.float32(1.0 / d_model)
    s1 = jnp.sum(r, axis=-1, keepdims=True)
    s2 = jnp.sum(r * r, axis=-1, keepdims=True)
    mean = s1 * inv_d
    var = s2 * inv_d - mean * mean
    y = (r - mean) * lax.rsqrt(var + 1e-5)
    o_ref[...] = (y * gamma_ref[...] + beta_ref[...]).astype(o_ref.dtype)


def _vmem_limit_bytes():
    """Generation-aware scoped-VMEM limit: ~75% of physical VMEM
    (96 MiB on v5e/v6e's 128 MiB, 48 MiB on v7x's 64 MiB)."""
    try:
        cap = int(pltpu.get_tpu_info().vmem_capacity_bytes)
    except Exception:
        cap = 64 * 1024 * 1024          # conservative fallback (fits v7x too)
    return max(32 * 1024 * 1024, min((cap * 3) // 4, 96 * 1024 * 1024))


def local_attention_forward(x, params, *, window_size, num_heads, q_tile=None):
    """x: (B, S, D).  params: dict from init_params (weights stored (in, out))."""
    B, S, D = x.shape
    assert D % num_heads == 0, "d_model must be divisible by num_heads"
    assert window_size >= 0
    head_dim = D // num_heads

    # Query-tile size: a multiple of 8 (sublane) dividing S, else the full S.
    if q_tile is None:
        q_tile = min(S, 128)
    if S % q_tile != 0 or (q_tile % 8 != 0 and q_tile != S):
        q_tile = S
    num_q_tiles = S // q_tile

    kernel = functools.partial(
        _local_attn_kernel,
        num_heads=num_heads,
        head_dim=head_dim,
        window_size=window_size,
    )

    operands = (
        x, x,                              # query-tile view + full-seq view
        params["wq"], params["bq"],
        params["wk"], params["bk"],
        params["wv"], params["bv"],
        params["wo"], params["bo"],
        params["gamma"], params["beta"],
    )

    def resident_spec(a):
        # Constant block index -> block stays resident in VMEM across steps.
        # TODO(synk): at large D use pipeline_mode=pl.Buffered(1) (single
        # buffer) or tile the N axis to halve the resident footprint on v7x.
        zeros = (0,) * a.ndim
        return pl.BlockSpec(a.shape, lambda b, qi, _z=zeros: _z)

    in_specs = [
        pl.BlockSpec((None, q_tile, D), lambda b, qi: (b, qi, 0)),  # x (q rows)
        pl.BlockSpec((None, S, D), lambda b, qi: (b, 0, 0)),        # x (all rows)
    ] + [resident_spec(a) for a in operands[2:]]
    out_spec = pl.BlockSpec((None, q_tile, D), lambda b, qi: (b, qi, 0))

    scratch_shapes = [
        pltpu.VMEM((S, D), MATMUL_DTYPE),       # K cache (per batch element)
        pltpu.VMEM((S, D), MATMUL_DTYPE),       # V cache
        pltpu.VMEM((q_tile, D), jnp.float32),   # per-head outputs (no concat)
    ]

    # Advisory cost estimate so XLA schedules around this kernel sensibly.
    flops = int(B * (8 * S * D * D + 4 * S * S * D))
    transcendentals = int(B * (num_heads * S * S + num_heads * S + S))
    bytes_accessed = int(4 * (3 * B * S * D + 4 * D * D + 6 * D))

    return pl.pallas_call(
        kernel,
        out_shape=jax.ShapeDtypeStruct((B, S, D), x.dtype),
        grid=(B, num_q_tiles),
        in_specs=in_specs,
        out_specs=out_spec,
        scratch_shapes=scratch_shapes,
        compiler_params=pltpu.CompilerParams(
            # Batch axis megacore-parallel; query-tile axis sequential so the
            # K/V cache written at qi == 0 is reused by the later tiles.
            dimension_semantics=("parallel", "arbitrary"),
            vmem_limit_bytes=_vmem_limit_bytes(),
        ),
        cost_estimate=pl.CostEstimate(
            flops=flops,
            transcendentals=transcendentals,
            bytes_accessed=bytes_accessed,
        ),
    )(*operands)


def init_params(key, d_model):
    """Synthetic init matching nn.Linear / nn.LayerNorm defaults.

    Linear weights are stored pre-transposed as (in, out) so both the kernel
    and the reference compute `x @ w + b` with zero per-call transposes.
    """
    ks = jax.random.split(key, 8)

    def linear(kw, kb, fan_in, fan_out):
        bound = 1.0 / math.sqrt(fan_in)
        w = jax.random.uniform(kw, (fan_in, fan_out), jnp.float32, -bound, bound)
        b = jax.random.uniform(kb, (1, fan_out), jnp.float32, -bound, bound)
        return w, b

    wq, bq = linear(ks[0], ks[1], d_model, d_model)
    wk, bk = linear(ks[2], ks[3], d_model, d_model)
    wv, bv = linear(ks[4], ks[5], d_model, d_model)
    wo, bo = linear(ks[6], ks[7], d_model, d_model)

    return {
        "wq": wq, "bq": bq,
        "wk": wk, "bk": bk,
        "wv": wv, "bv": bv,
        "wo": wo, "bo": bo,
        "gamma": jnp.ones((1, d_model), jnp.float32),
        "beta": jnp.zeros((1, d_model), jnp.float32),
    }


def reference_forward(x, params, *, window_size, num_heads):
    """Pure-JAX reference mirroring the PyTorch module (eval mode)."""
    B, S, D = x.shape
    Dh = D // num_heads
    P = lax.Precision.HIGHEST

    q = jnp.dot(x, params["wq"], precision=P) + params["bq"]
    k = jnp.dot(x, params["wk"], precision=P) + params["bk"]
    v = jnp.dot(x, params["wv"], precision=P) + params["bv"]

    q = q.reshape(B, S, num_heads, Dh).transpose(0, 2, 1, 3)
    k = k.reshape(B, S, num_heads, Dh).transpose(0, 2, 1, 3)
    v = v.reshape(B, S, num_heads, Dh).transpose(0, 2, 1, 3)

    scores = jnp.einsum("bhqd,bhkd->bhqk", q, k, precision=P) / math.sqrt(Dh)

    i = jnp.arange(S)[:, None]
    j = jnp.arange(S)[None, :]
    half = window_size // 2
    mask = (j >= i - half) & (j <= i + half)
    scores = jnp.where(mask[None, None], scores, -jnp.inf)

    probs = jax.nn.softmax(scores, axis=-1)
    out = jnp.einsum("bhqk,bhkd->bhqd", probs, v, precision=P)
    out = out.transpose(0, 2, 1, 3).reshape(B, S, D)
    out = jnp.dot(out, params["wo"], precision=P) + params["bo"]

    h = x + out
    mean = jnp.mean(h, axis=-1, keepdims=True)
    var = jnp.mean(jnp.square(h - mean), axis=-1, keepdims=True)
    y = (h - mean) / jnp.sqrt(var + 1e-5)
    return y * params["gamma"] + params["beta"]


if __name__ == "__main__":
    # Small shapes consistent with the module; d_model chosen lane-dense (128).
    B, S, D = 2, 16, 128
    NUM_HEADS = 8      # demo heads: the file-level num_heads=48 doesn't divide 128
    WINDOW_SIZE = 4
    Q_TILE = 8         # 2 query tiles per batch -> >1 pipelined grid step per core

    key = jax.random.PRNGKey(0)
    k_param, k_x = jax.random.split(key)
    params = init_params(k_param, D)
    x = jax.random.normal(k_x, (B, S, D), jnp.float32)

    out = local_attention_forward(
        x, params, window_size=WINDOW_SIZE, num_heads=NUM_HEADS, q_tile=Q_TILE)
    out = jax.block_until_ready(out)

    ref = reference_forward(
        x, params, window_size=WINDOW_SIZE, num_heads=NUM_HEADS)

    assert out.shape == (B, S, D)
    assert bool(jnp.all(jnp.isfinite(out))), "non-finite values in kernel output"
    assert jnp.allclose(out, ref, atol=2e-3, rtol=2e-3), "mismatch vs reference"

    print("KERNEL_OK")
</pallas_src>

<mosaic_0001>
module attributes {stable_mosaic.version = 11 : i64} {
  func.func @_local_attn_kernel(%arg0: i32, %arg1: i32, %arg2: memref<1x8x128xf32, #tpu.memory_space<vmem>>, %arg3: memref<1x16x128xf32, #tpu.memory_space<vmem>>, %arg4: memref<128x128xf32, #tpu.memory_space<vmem>>, %arg5: memref<1x128xf32, #tpu.memory_space<vmem>>, %arg6: memref<128x128xf32, #tpu.memory_space<vmem>>, %arg7: memref<1x128xf32, #tpu.memory_space<vmem>>, %arg8: memref<128x128xf32, #tpu.memory_space<vmem>>, %arg9: memref<1x128xf32, #tpu.memory_space<vmem>>, %arg10: memref<128x128xf32, #tpu.memory_space<vmem>>, %arg11: memref<1x128xf32, #tpu.memory_space<vmem>>, %arg12: memref<1x128xf32, #tpu.memory_space<vmem>>, %arg13: memref<1x128xf32, #tpu.memory_space<vmem>>, %arg14: memref<1x8x128xf32, #tpu.memory_space<vmem>>, %arg15: memref<16x128xf32, #tpu.memory_space<vmem>>, %arg16: memref<16x128xf32, #tpu.memory_space<vmem>>, %arg17: memref<8x128xf32, #tpu.memory_space<vmem>>) attributes {dimension_semantics = [#tpu.dimension_semantics<parallel>, #tpu.dimension_semantics<arbitrary>], iteration_bounds = array<i64: 2, 2>, scalar_prefetch = 0 : i64, scratch_operands = 3 : i64, tpu.core_type = #tpu.core_type<tc>, window_params = [{transform_indices = @transform_0, window_bounds = array<i64: 1, 8, 128>}, {transform_indices = @transform_1, window_bounds = array<i64: 1, 16, 128>}, {pipeline_mode = #tpu.pipeline_mode<synchronous>, transform_indices = @transform_2, window_bounds = array<i64: 128, 128>}, {pipeline_mode = #tpu.pipeline_mode<synchronous>, transform_indices = @transform_3, window_bounds = array<i64: 1, 128>}, {pipeline_mode = #tpu.pipeline_mode<synchronous>, transform_indices = @transform_4, window_bounds = array<i64: 128, 128>}, {pipeline_mode = #tpu.pipeline_mode<synchronous>, transform_indices = @transform_5, window_bounds = array<i64: 1, 128>}, {pipeline_mode = #tpu.pipeline_mode<synchronous>, transform_indices = @transform_6, window_bounds = array<i64: 128, 128>}, {pipeline_mode = #tpu.pipeline_mode<synchronous>, transform_indices = @transform_7, window_bounds = array<i64: 1, 128>}, {pipeline_mode = #tpu.pipeline_mode<synchronous>, transform_indices = @transform_8, window_bounds = array<i64: 128, 128>}, {pipeline_mode = #tpu.pipeline_mode<synchronous>, transform_indices = @transform_9, window_bounds = array<i64: 1, 128>}, {pipeline_mode = #tpu.pipeline_mode<synchronous>, transform_indices = @transform_10, window_bounds = array<i64: 1, 128>}, {pipeline_mode = #tpu.pipeline_mode<synchronous>, transform_indices = @transform_11, window_bounds = array<i64: 1, 128>}, {transform_indices = @transform_12, window_bounds = array<i64: 1, 8, 128>}]} {
    %c0_i32 = arith.constant 0 : i32
    %0 = arith.cmpi eq, %arg1, %c0_i32 : i32
    %1 = arith.extui %0 : i1 to i32
    %c0_i32_0 = arith.constant 0 : i32
    %2 = arith.cmpi ne, %1, %c0_i32_0 : i32
    scf.if %2 {
      %c0_81 = arith.constant 0 : index
      %c0_82 = arith.constant 0 : index
      %c0_83 = arith.constant 0 : index
      %204 = vector.load %arg3[%c0_81, %c0_82, %c0_83] : memref<1x16x128xf32, #tpu.memory_space<vmem>>, vector<1x16x128xf32>
      %205 = vector.shape_cast %204 : vector<1x16x128xf32> to vector<16x128xf32>
      %c0_84 = arith.constant 0 : index
      %c0_85 = arith.constant 0 : index
      %206 = vector.load %arg6[%c0_84, %c0_85] : memref<128x128xf32, #tpu.memory_space<vmem>>, vector<128x128xf32>
      %cst_86 = arith.constant dense<0.000000e+00> : vector<16x128xf32>
      %207 = tpu.matmul %205, %206, %cst_86 {dimension_numbers = #tpu.dot_dimension_numbers<[1], [0], [0], [1], [0, 0, 1, 1], [], []>} : vector<16x128xf32>, vector<128x128xf32>, vector<16x128xf32> -> vector<16x128xf32>
      %c0_87 = arith.constant 0 : index
      %c0_88 = arith.constant 0 : index
      %208 = vector.load %arg7[%c0_87, %c0_88] : memref<1x128xf32, #tpu.memory_space<vmem>>, vector<1x128xf32>
      %209 = vector.broadcast %208 : vector<1x128xf32> to vector<16x128xf32>
      %210 = arith.addf %207, %209 : vector<16x128xf32>
      %c0_89 = arith.constant 0 : index
      %c0_90 = arith.constant 0 : index
      %211 = vector.load %arg8[%c0_89, %c0_90] : memref<128x128xf32, #tpu.memory_space<vmem>>, vector<128x128xf32>
      %cst_91 = arith.constant dense<0.000000e+00> : vector<16x128xf32>
      %212 = tpu.matmul %205, %211, %cst_91 {dimension_numbers = #tpu.dot_dimension_numbers<[1], [0], [0], [1], [0, 0, 1, 1], [], []>} : vector<16x128xf32>, vector<128x128xf32>, vector<16x128xf32> -> vector<16x128xf32>
      %c0_92 = arith.constant 0 : index
      %c0_93 = arith.constant 0 : index
      %213 = vector.load %arg9[%c0_92, %c0_93] : memref<1x128xf32, #tpu.memory_space<vmem>>, vector<1x128xf32>
      %214 = vector.broadcast %213 : vector<1x128xf32> to vector<16x128xf32>
      %215 = arith.addf %212, %214 : vector<16x128xf32>
      %c0_94 = arith.constant 0 : index
      %c0_95 = arith.constant 0 : index
      %216 = vector.load %arg15[%c0_94, %c0_95] : memref<16x128xf32, #tpu.memory_space<vmem>>, vector<16x128xf32>
      tpu.vector_store %arg15[%c0_94, %c0_95], %210 {strides = array<i32>} : memref<16x128xf32, #tpu.memory_space<vmem>>, vector<16x128xf32>,
      %c0_96 = arith.constant 0 : index
      %c0_97 = arith.constant 0 : index
      %217 = vector.load %arg16[%c0_96, %c0_97] : memref<16x128xf32, #tpu.memory_space<vmem>>, vector<16x128xf32>
      tpu.vector_store %arg16[%c0_96, %c0_97], %215 {strides = array<i32>} : memref<16x128xf32, #tpu.memory_space<vmem>>, vector<16x128xf32>,
    } else {
    }
    %c0 = arith.constant 0 : index
    %c0_1 = arith.constant 0 : index
    %c0_2 = arith.constant 0 : index
    %3 = vector.load %arg2[%c0, %c0_1, %c0_2] : memref<1x8x128xf32, #tpu.memory_space<vmem>>, vector<1x8x128xf32>
    %4 = vector.shape_cast %3 : vector<1x8x128xf32> to vector<8x128xf32>
    %c0_3 = arith.constant 0 : index
    %c0_4 = arith.constant 0 : index
    %5 = vector.load %arg4[%c0_3, %c0_4] : memref<128x128xf32, #tpu.memory_space<vmem>>, vector<128x128xf32>
    %cst = arith.constant dense<0.000000e+00> : vector<8x128xf32>
    %6 = tpu.matmul %4, %5, %cst {dimension_numbers = #tpu.dot_dimension_numbers<[1], [0], [0], [1], [0, 0, 1, 1], [], []>} : vector<8x128xf32>, vector<128x128xf32>, vector<8x128xf32> -> vector<8x128xf32>
    %c0_5 = arith.constant 0 : index
    %c0_6 = arith.constant 0 : index
    %7 = vector.load %arg5[%c0_5, %c0_6] : memref<1x128xf32, #tpu.memory_space<vmem>>, vector<1x128xf32>
    %8 = vector.broadcast %7 : vector<1x128xf32> to vector<8x128xf32>
    %9 = arith.addf %6, %8 : vector<8x128xf32>
    %cst_7 = arith.constant 2.500000e-01 : f32
    %10 = vector.broadcast %cst_7 : f32 to vector<8x128xf32>
    %11 = arith.mulf %9, %10 : vector<8x128xf32>
    %12 = tpu.iota {dimensions = array<i32: 0>} : vector<8x16xi32>
    %c8_i32 = arith.constant 8 : i32
    %13 = arith.muli %arg1, %c8_i32 : i32
    %14 = vector.broadcast %13 : i32 to vector<8x16xi32>
    %15 = arith.addi %12, %14 : vector<8x16xi32>
    %16 = tpu.iota {dimensions = array<i32: 1>} : vector<8x16xi32>
    %c2_i32 = arith.constant 2 : i32
    %17 = vector.broadcast %c2_i32 : i32 to vector<8x16xi32>
    %18 = arith.subi %15, %17 : vector<8x16xi32>
    %19 = arith.cmpi sge, %16, %18 : vector<8x16xi32>
    %c2_i32_8 = arith.constant 2 : i32
    %20 = vector.broadcast %c2_i32_8 : i32 to vector<8x16xi32>
    %21 = arith.addi %15, %20 : vector<8x16xi32>
    %22 = arith.cmpi sle, %16, %21 : vector<8x16xi32>
    %23 = arith.andi %19, %22 : vector<8x16xi1>
    %c0_9 = arith.constant 0 : index
    %c0_10 = arith.constant 0 : index
    %24 = vector.load %arg15[%c0_9, %c0_10] : memref<16x128xf32, #tpu.memory_space<vmem>>, vector<16x128xf32>
    %c0_11 = arith.constant 0 : index
    %c0_12 = arith.constant 0 : index
    %25 = vector.load %arg16[%c0_11, %c0_12] : memref<16x128xf32, #tpu.memory_space<vmem>>, vector<16x128xf32>
    %26 = vector.extract_strided_slice %11 {offsets = [0, 0], sizes = [8, 16], strides = [1, 1]} : vector<8x128xf32> to vector<8x16xf32>
    %27 = vector.extract_strided_slice %24 {offsets = [0, 0], sizes = [16, 16], strides = [1, 1]} : vector<16x128xf32> to vector<16x16xf32>
    %28 = vector.extract_strided_slice %25 {offsets = [0, 0], sizes = [16, 16], strides = [1, 1]} : vector<16x128xf32> to vector<16x16xf32>
    %cst_13 = arith.constant dense<0.000000e+00> : vector<8x16xf32>
    %29 = tpu.matmul %26, %27, %cst_13 {dimension_numbers = #tpu.dot_dimension_numbers<[1], [1], [0], [0], [0, 0, 1, 0], [], []>} : vector<8x16xf32>, vector<16x16xf32>, vector<8x16xf32> -> vector<8x16xf32>
    %cst_14 = arith.constant 0xFF800000 : f32
    %30 = vector.broadcast %cst_14 : f32 to vector<8x16xf32>
    %31 = arith.select %23, %29, %30 : vector<8x16xi1>, vector<8x16xf32>
    %cst_15 = arith.constant dense<0xFF800000> : vector<8xf32>
    %32 = vector.multi_reduction <maximumf>, %31, %cst_15 [1] : vector<8x16xf32> to vector<8xf32>
    %33 = vector.shape_cast %32 : vector<8xf32> to vector<8x1xf32>
    %34 = vector.broadcast %33 : vector<8x1xf32> to vector<8x16xf32>
    %35 = arith.subf %31, %34 : vector<8x16xf32>
    %36 = math.exp %35 : vector<8x16xf32>
    %cst_16 = arith.constant dense<0.000000e+00> : vector<8xf32>
    %37 = vector.multi_reduction <add>, %36, %cst_16 [1] : vector<8x16xf32> to vector<8xf32>
    %38 = vector.shape_cast %37 : vector<8xf32> to vector<8x1xf32>
    %cst_17 = arith.constant dense<0.000000e+00> : vector<8x16xf32>
    %39 = tpu.matmul %36, %28, %cst_17 {dimension_numbers = #tpu.dot_dimension_numbers<[1], [0], [0], [1], [0, 0, 1, 1], [], []>} : vector<8x16xf32>, vector<16x16xf32>, vector<8x16xf32> -> vector<8x16xf32>
    %40 = tpu.reciprocal %38 {approx = true} : vector<8x1xf32> -> vector<8x1xf32>
    %41 = vector.broadcast %40 : vector<8x1xf32> to vector<8x16xf32>
    %42 = arith.mulf %39, %41 : vector<8x16xf32>
    %c0_18 = arith.constant 0 : index
    %c0_19 = arith.constant 0 : index
    %43 = vector.load %arg17[%c0_18, %c0_19] : memref<8x128xf32, #tpu.memory_space<vmem>>, vector<8x16xf32>
    tpu.vector_store %arg17[%c0_18, %c0_19], %42 {strides = array<i32>} : memref<8x128xf32, #tpu.memory_space<vmem>>, vector<8x16xf32>,
    %44 = vector.extract_strided_slice %11 {offsets = [0, 16], sizes = [8, 16], strides = [1, 1]} : vector<8x128xf32> to vector<8x16xf32>
    %45 = vector.extract_strided_slice %24 {offsets = [0, 16], sizes = [16, 16], strides = [1, 1]} : vector<16x128xf32> to vector<16x16xf32>
    %46 = vector.extract_strided_slice %25 {offsets = [0, 16], sizes = [16, 16], strides = [1, 1]} : vector<16x128xf32> to vector<16x16xf32>
    %cst_20 = arith.constant dense<0.000000e+00> : vector<8x16xf32>
    %47 = tpu.matmul %44, %45, %cst_20 {dimension_numbers = #tpu.dot_dimension_numbers<[1], [1], [0], [0], [0, 0, 1, 0], [], []>} : vector<8x16xf32>, vector<16x16xf32>, vector<8x16xf32> -> vector<8x16xf32>
    %cst_21 = arith.constant 0xFF800000 : f32
    %48 = vector.broadcast %cst_21 : f32 to vector<8x16xf32>
    %49 = arith.select %23, %47, %48 : vector<8x16xi1>, vector<8x16xf32>
    %cst_22 = arith.constant dense<0xFF800000> : vector<8xf32>
    %50 = vector.multi_reduction <maximumf>, %49, %cst_22 [1] : vector<8x16xf32> to vector<8xf32>
    %51 = vector.shape_cast %50 : vector<8xf32> to vector<8x1xf32>
    %52 = vector.broadcast %51 : vector<8x1xf32> to vector<8x16xf32>
    %53 = arith.subf %49, %52 : vector<8x16xf32>
    %54 = math.exp %53 : vector<8x16xf32>
    %cst_23 = arith.constant dense<0.000000e+00> : vector<8xf32>
    %55 = vector.multi_reduction <add>, %54, %cst_23 [1] : vector<8x16xf32> to vector<8xf32>
    %56 = vector.shape_cast %55 : vector<8xf32> to vector<8x1xf32>
    %cst_24 = arith.constant dense<0.000000e+00> : vector<8x16xf32>
    %57 = tpu.matmul %54, %46, %cst_24 {dimension_numbers = #tpu.dot_dimension_numbers<[1], [0], [0], [1], [0, 0, 1, 1], [], []>} : vector<8x16xf32>, vector<16x16xf32>, vector<8x16xf32> -> vector<8x16xf32>
    %58 = tpu.reciprocal %56 {approx = true} : vector<8x1xf32> -> vector<8x1xf32>
    %59 = vector.broadcast %58 : vector<8x1xf32> to vector<8x16xf32>
    %60 = arith.mulf %57, %59 : vector<8x16xf32>
    %c0_25 = arith.constant 0 : index
    %c16 = arith.constant 16 : index
    %61 = vector.load %arg17[%c0_25, %c16] : memref<8x128xf32, #tpu.memory_space<vmem>>, vector<8x16xf32>
    tpu.vector_store %arg17[%c0_25, %c16], %60 {strides = array<i32>} : memref<8x128xf32, #tpu.memory_space<vmem>>, vector<8x16xf32>,
    %62 = vector.extract_strided_slice %11 {offsets = [0, 32], sizes = [8, 16], strides = [1, 1]} : vector<8x128xf32> to vector<8x16xf32>
    %63 = vector.extract_strided_slice %24 {offsets = [0, 32], sizes = [16, 16], strides = [1, 1]} : vector<16x128xf32> to vector<16x16xf32>
    %64 = vector.extract_strided_slice %25 {offsets = [0, 32], sizes = [16, 16], strides = [1, 1]} : vector<16x128xf32> to vector<16x16xf32>
    %cst_26 = arith.constant dense<0.000000e+00> : vector<8x16xf32>
    %65 = tpu.matmul %62, %63, %cst_26 {dimension_numbers = #tpu.dot_dimension_numbers<[1], [1], [0], [0], [0, 0, 1, 0], [], []>} : vector<8x16xf32>, vector<16x16xf32>, vector<8x16xf32> -> vector<8x16xf32>
    %cst_27 = arith.constant 0xFF800000 : f32
    %66 = vector.broadcast %cst_27 : f32 to vector<8x16xf32>
    %67 = arith.select %23, %65, %66 : vector<8x16xi1>, vector<8x16xf32>
    %cst_28 = arith.constant dense<0xFF800000> : vector<8xf32>
    %68 = vector.multi_reduction <maximumf>, %67, %cst_28 [1] : vector<8x16xf32> to vector<8xf32>
    %69 = vector.shape_cast %68 : vector<8xf32> to vector<8x1xf32>
    %70 = vector.broadcast %69 : vector<8x1xf32> to vector<8x16xf32>
    %71 = arith.subf %67, %70 : vector<8x16xf32>
    %72 = math.exp %71 : vector<8x16xf32>
    %cst_29 = arith.constant dense<0.000000e+00> : vector<8xf32>
    %73 = vector.multi_reduction <add>, %72, %cst_29 [1] : vector<8x16xf32> to vector<8xf32>
    %74 = vector.shape_cast %73 : vector<8xf32> to vector<8x1xf32>
    %cst_30 = arith.constant dense<0.000000e+00> : vector<8x16xf32>
    %75 = tpu.matmul %72, %64, %cst_30 {dimension_numbers = #tpu.dot_dimension_numbers<[1], [0], [0], [1], [0, 0, 1, 1], [], []>} : vector<8x16xf32>, vector<16x16xf32>, vector<8x16xf32> -> vector<8x16xf32>
    %76 = tpu.reciprocal %74 {approx = true} : vector<8x1xf32> -> vector<8x1xf32>
    %77 = vector.broadcast %76 : vector<8x1xf32> to vector<8x16xf32>
    %78 = arith.mulf %75, %77 : vector<8x16xf32>
    %c0_31 = arith.constant 0 : index
    %c32 = arith.constant 32 : index
    %79 = vector.load %arg17[%c0_31, %c32] : memref<8x128xf32, #tpu.memory_space<vmem>>, vector<8x16xf32>
    tpu.vector_store %arg17[%c0_31, %c32], %78 {strides = array<i32>} : memref<8x128xf32, #tpu.memory_space<vmem>>, vector<8x16xf32>,
    %80 = vector.extract_strided_slice %11 {offsets = [0, 48], sizes = [8, 16], strides = [1, 1]} : vector<8x128xf32> to vector<8x16xf32>
    %81 = vector.extract_strided_slice %24 {offsets = [0, 48], sizes = [16, 16], strides = [1, 1]} : vector<16x128xf32> to vector<16x16xf32>
    %82 = vector.extract_strided_slice %25 {offsets = [0, 48], sizes = [16, 16], strides = [1, 1]} : vector<16x128xf32> to vector<16x16xf32>
    %cst_32 = arith.constant dense<0.000000e+00> : vector<8x16xf32>
    %83 = tpu.matmul %80, %81, %cst_32 {dimension_numbers = #tpu.dot_dimension_numbers<[1], [1], [0], [0], [0, 0, 1, 0], [], []>} : vector<8x16xf32>, vector<16x16xf32>, vector<8x16xf32> -> vector<8x16xf32>
    %cst_33 = arith.constant 0xFF800000 : f32
    %84 = vector.broadcast %cst_33 : f32 to vector<8x16xf32>
    %85 = arith.select %23, %83, %84 : vector<8x16xi1>, vector<8x16xf32>
    %cst_34 = arith.constant dense<0xFF800000> : vector<8xf32>
    %86 = vector.multi_reduction <maximumf>, %85, %cst_34 [1] : vector<8x16xf32> to vector<8xf32>
    %87 = vector.shape_cast %86 : vector<8xf32> to vector<8x1xf32>
    %88 = vector.broadcast %87 : vector<8x1xf32> to vector<8x16xf32>
    %89 = arith.subf %85, %88 : vector<8x16xf32>
    %90 = math.exp %89 : vector<8x16xf32>
    %cst_35 = arith.constant dense<0.000000e+00> : vector<8xf32>
    %91 = vector.multi_reduction <add>, %90, %cst_35 [1] : vector<8x16xf32> to vector<8xf32>
    %92 = vector.shape_cast %91 : vector<8xf32> to vector<8x1xf32>
    %cst_36 = arith.constant dense<0.000000e+00> : vector<8x16xf32>
    %93 = tpu.matmul %90, %82, %cst_36 {dimension_numbers = #tpu.dot_dimension_numbers<[1], [0], [0], [1], [0, 0, 1, 1], [], []>} : vector<8x16xf32>, vector<16x16xf32>, vector<8x16xf32> -> vector<8x16xf32>
    %94 = tpu.reciprocal %92 {approx = true} : vector<8x1xf32> -> vector<8x1xf32>
    %95 = vector.broadcast %94 : vector<8x1xf32> to vector<8x16xf32>
    %96 = arith.mulf %93, %95 : vector<8x16xf32>
    %c0_37 = arith.constant 0 : index
    %c48 = arith.constant 48 : index
    %97 = vector.load %arg17[%c0_37, %c48] : memref<8x128xf32, #tpu.memory_space<vmem>>, vector<8x16xf32>
    tpu.vector_store %arg17[%c0_37, %c48], %96 {strides = array<i32>} : memref<8x128xf32, #tpu.memory_space<vmem>>, vector<8x16xf32>,
    %98 = vector.extract_strided_slice %11 {offsets = [0, 64], sizes = [8, 16], strides = [1, 1]} : vector<8x128xf32> to vector<8x16xf32>
    %99 = vector.extract_strided_slice %24 {offsets = [0, 64], sizes = [16, 16], strides = [1, 1]} : vector<16x128xf32> to vector<16x16xf32>
    %100 = vector.extract_strided_slice %25 {offsets = [0, 64], sizes = [16, 16], strides = [1, 1]} : vector<16x128xf32> to vector<16x16xf32>
    %cst_38 = arith.constant dense<0.000000e+00> : vector<8x16xf32>
    %101 = tpu.matmul %98, %99, %cst_38 {dimension_numbers = #tpu.dot_dimension_numbers<[1], [1], [0], [0], [0, 0, 1, 0], [], []>} : vector<8x16xf32>, vector<16x16xf32>, vector<8x16xf32> -> vector<8x16xf32>
    %cst_39 = arith.constant 0xFF800000 : f32
    %102 = vector.broadcast %cst_39 : f32 to vector<8x16xf32>
    %103 = arith.select %23, %101, %102 : vector<8x16xi1>, vector<8x16xf32>
    %cst_40 = arith.constant dense<0xFF800000> : vector<8xf32>
    %104 = vector.multi_reduction <maximumf>, %103, %cst_40 [1] : vector<8x16xf32> to vector<8xf32>
    %105 = vector.shape_cast %104 : vector<8xf32> to vector<8x1xf32>
    %106 = vector.broadcast %105 : vector<8x1xf32> to vector<8x16xf32>
    %107 = arith.subf %103, %106 : vector<8x16xf32>
    %108 = math.exp %107 : vector<8x16xf32>
    %cst_41 = arith.constant dense<0.000000e+00> : vector<8xf32>
    %109 = vector.multi_reduction <add>, %108, %cst_41 [1] : vector<8x16xf32> to vector<8xf32>
    %110 = vector.shape_cast %109 : vector<8xf32> to vector<8x1xf32>
    %cst_42 = arith.constant dense<0.000000e+00> : vector<8x16xf32>
    %111 = tpu.matmul %108, %100, %cst_42 {dimension_numbers = #tpu.dot_dimension_numbers<[1], [0], [0], [1], [0, 0, 1, 1], [], []>} : vector<8x16xf32>, vector<16x16xf32>, vector<8x16xf32> -> vector<8x16xf32>
    %112 = tpu.reciprocal %110 {approx = true} : vector<8x1xf32> -> vector<8x1xf32>
    %113 = vector.broadcast %112 : vector<8x1xf32> to vector<8x16xf32>
    %114 = arith.mulf %111, %113 : vector<8x16xf32>
    %c0_43 = arith.constant 0 : index
    %c64 = arith.constant 64 : index
    %115 = vector.load %arg17[%c0_43, %c64] : memref<8x128xf32, #tpu.memory_space<vmem>>, vector<8x16xf32>
    tpu.vector_store %arg17[%c0_43, %c64], %114 {strides = array<i32>} : memref<8x128xf32, #tpu.memory_space<vmem>>, vector<8x16xf32>,
    %116 = vector.extract_strided_slice %11 {offsets = [0, 80], sizes = [8, 16], strides = [1, 1]} : vector<8x128xf32> to vector<8x16xf32>
    %117 = vector.extract_strided_slice %24 {offsets = [0, 80], sizes = [16, 16], strides = [1, 1]} : vector<16x128xf32> to vector<16x16xf32>
    %118 = vector.extract_strided_slice %25 {offsets = [0, 80], sizes = [16, 16], strides = [1, 1]} : vector<16x128xf32> to vector<16x16xf32>
    %cst_44 = arith.constant dense<0.000000e+00> : vector<8x16xf32>
    %119 = tpu.matmul %116, %117, %cst_44 {dimension_numbers = #tpu.dot_dimension_numbers<[1], [1], [0], [0], [0, 0, 1, 0], [], []>} : vector<8x16xf32>, vector<16x16xf32>, vector<8x16xf32> -> vector<8x16xf32>
    %cst_45 = arith.constant 0xFF800000 : f32
    %120 = vector.broadcast %cst_45 : f32 to vector<8x16xf32>
    %121 = arith.select %23, %119, %120 : vector<8x16xi1>, vector<8x16xf32>
    %cst_46 = arith.constant dense<0xFF800000> : vector<8xf32>
    %122 = vector.multi_reduction <maximumf>, %121, %cst_46 [1] : vector<8x16xf32> to vector<8xf32>
    %123 = vector.shape_cast %122 : vector<8xf32> to vector<8x1xf32>
    %124 = vector.broadcast %123 : vector<8x1xf32> to vector<8x16xf32>
    %125 = arith.subf %121, %124 : vector<8x16xf32>
    %126 = math.exp %125 : vector<8x16xf32>
    %cst_47 = arith.constant dense<0.000000e+00> : vector<8xf32>
    %127 = vector.multi_reduction <add>, %126, %cst_47 [1] : vector<8x16xf32> to vector<8xf32>
    %128 = vector.shape_cast %127 : vector<8xf32> to vector<8x1xf32>
    %cst_48 = arith.constant dense<0.000000e+00> : vector<8x16xf32>
    %129 = tpu.matmul %126, %118, %cst_48 {dimension_numbers = #tpu.dot_dimension_numbers<[1], [0], [0], [1], [0, 0, 1, 1], [], []>} : vector<8x16xf32>, vector<16x16xf32>, vector<8x16xf32> -> vector<8x16xf32>
    %130 = tpu.reciprocal %128 {approx = true} : vector<8x1xf32> -> vector<8x1xf32>
    %131 = vector.broadcast %130 : vector<8x1xf32> to vector<8x16xf32>
    %132 = arith.mulf %129, %131 : vector<8x16xf32>
    %c0_49 = arith.constant 0 : index
    %c80 = arith.constant 80 : index
    %133 = vector.load %arg17[%c0_49, %c80] : memref<8x128xf32, #tpu.memory_space<vmem>>, vector<8x16xf32>
    tpu.vector_store %arg17[%c0_49, %c80], %132 {strides = array<i32>} : memref<8x128xf32, #tpu.memory_space<vmem>>, vector<8x16xf32>,
    %134 = vector.extract_strided_slice %11 {offsets = [0, 96], sizes = [8, 16], strides = [1, 1]} : vector<8x128xf32> to vector<8x16xf32>
    %135 = vector.extract_strided_slice %24 {offsets = [0, 96], sizes = [16, 16], strides = [1, 1]} : vector<16x128xf32> to vector<16x16xf32>
    %136 = vector.extract_strided_slice %25 {offsets = [0, 96], sizes = [16, 16], strides = [1, 1]} : vector<16x128xf32> to vector<16x16xf32>
    %cst_50 = arith.constant dense<0.000000e+00> : vector<8x16xf32>
    %137 = tpu.matmul %134, %135, %cst_50 {dimension_numbers = #tpu.dot_dimension_numbers<[1], [1], [0], [0], [0, 0, 1, 0], [], []>} : vector<8x16xf32>, vector<16x16xf32>, vector<8x16xf32> -> vector<8x16xf32>
    %cst_51 = arith.constant 0xFF800000 : f32
    %138 = vector.broadcast %cst_51 : f32 to vector<8x16xf32>
    %139 = arith.select %23, %137, %138 : vector<8x16xi1>, vector<8x16xf32>
    %cst_52 = arith.constant dense<0xFF800000> : vector<8xf32>
    %140 = vector.multi_reduction <maximumf>, %139, %cst_52 [1] : vector<8x16xf32> to vector<8xf32>
    %141 = vector.shape_cast %140 : vector<8xf32> to vector<8x1xf32>
    %142 = vector.broadcast %141 : vector<8x1xf32> to vector<8x16xf32>
    %143 = arith.subf %139, %142 : vector<8x16xf32>
    %144 = math.exp %143 : vector<8x16xf32>
    %cst_53 = arith.constant dense<0.000000e+00> : vector<8xf32>
    %145 = vector.multi_reduction <add>, %144, %cst_53 [1] : vector<8x16xf32> to vector<8xf32>
    %146 = vector.shape_cast %145 : vector<8xf32> to vector<8x1xf32>
    %cst_54 = arith.constant dense<0.000000e+00> : vector<8x16xf32>
    %147 = tpu.matmul %144, %136, %cst_54 {dimension_numbers = #tpu.dot_dimension_numbers<[1], [0], [0], [1], [0, 0, 1, 1], [], []>} : vector<8x16xf32>, vector<16x16xf32>, vector<8x16xf32> -> vector<8x16xf32>
    %148 = tpu.reciprocal %146 {approx = true} : vector<8x1xf32> -> vector<8x1xf32>
    %149 = vector.broadcast %148 : vector<8x1xf32> to vector<8x16xf32>
    %150 = arith.mulf %147, %149 : vector<8x16xf32>
    %c0_55 = arith.constant 0 : index
    %c96 = arith.constant 96 : index
    %151 = vector.load %arg17[%c0_55, %c96] : memref<8x128xf32, #tpu.memory_space<vmem>>, vector<8x16xf32>
    tpu.vector_store %arg17[%c0_55, %c96], %150 {strides = array<i32>} : memref<8x128xf32, #tpu.memory_space<vmem>>, vector<8x16xf32>,
    %152 = vector.extract_strided_slice %11 {offsets = [0, 112], sizes = [8, 16], strides = [1, 1]} : vector<8x128xf32> to vector<8x16xf32>
    %153 = vector.extract_strided_slice %24 {offsets = [0, 112], sizes = [16, 16], strides = [1, 1]} : vector<16x128xf32> to vector<16x16xf32>
    %154 = vector.extract_strided_slice %25 {offsets = [0, 112], sizes = [16, 16], strides = [1, 1]} : vector<16x128xf32> to vector<16x16xf32>
    %cst_56 = arith.constant dense<0.000000e+00> : vector<8x16xf32>
    %155 = tpu.matmul %152, %153, %cst_56 {dimension_numbers = #tpu.dot_dimension_numbers<[1], [1], [0], [0], [0, 0, 1, 0], [], []>} : vector<8x16xf32>, vector<16x16xf32>, vector<8x16xf32> -> vector<8x16xf32>
    %cst_57 = arith.constant 0xFF800000 : f32
    %156 = vector.broadcast %cst_57 : f32 to vector<8x16xf32>
    %157 = arith.select %23, %155, %156 : vector<8x16xi1>, vector<8x16xf32>
    %cst_58 = arith.constant dense<0xFF800000> : vector<8xf32>
    %158 = vector.multi_reduction <maximumf>, %157, %cst_58 [1] : vector<8x16xf32> to vector<8xf32>
    %159 = vector.shape_cast %158 : vector<8xf32> to vector<8x1xf32>
    %160 = vector.broadcast %159 : vector<8x1xf32> to vector<8x16xf32>
    %161 = arith.subf %157, %160 : vector<8x16xf32>
    %162 = math.exp %161 : vector<8x16xf32>
    %cst_59 = arith.constant dense<0.000000e+00> : vector<8xf32>
    %163 = vector.multi_reduction <add>, %162, %cst_59 [1] : vector<8x16xf32> to vector<8xf32>
    %164 = vector.shape_cast %163 : vector<8xf32> to vector<8x1xf32>
    %cst_60 = arith.constant dense<0.000000e+00> : vector<8x16xf32>
    %165 = tpu.matmul %162, %154, %cst_60 {dimension_numbers = #tpu.dot_dimension_numbers<[1], [0], [0], [1], [0, 0, 1, 1], [], []>} : vector<8x16xf32>, vector<16x16xf32>, vector<8x16xf32> -> vector<8x16xf32>
    %166 = tpu.reciprocal %164 {approx = true} : vector<8x1xf32> -> vector<8x1xf32>
    %167 = vector.broadcast %166 : vector<8x1xf32> to vector<8x16xf32>
    %168 = arith.mulf %165, %167 : vector<8x16xf32>
    %c0_61 = arith.constant 0 : index
    %c112 = arith.constant 112 : index
    %169 = vector.load %arg17[%c0_61, %c112] : memref<8x128xf32, #tpu.memory_space<vmem>>, vector<8x16xf32>
    tpu.vector_store %arg17[%c0_61, %c112], %168 {strides = array<i32>} : memref<8x128xf32, #tpu.memory_space<vmem>>, vector<8x16xf32>,
    %c0_62 = arith.constant 0 : index
    %c0_63 = arith.constant 0 : index
    %170 = vector.load %arg17[%c0_62, %c0_63] : memref<8x128xf32, #tpu.memory_space<vmem>>, vector<8x128xf32>
    %c0_64 = arith.constant 0 : index
    %c0_65 = arith.constant 0 : index
    %171 = vector.load %arg10[%c0_64, %c0_65] : memref<128x128xf32, #tpu.memory_space<vmem>>, vector<128x128xf32>
    %cst_66 = arith.constant dense<0.000000e+00> : vector<8x128xf32>
    %172 = tpu.matmul %170, %171, %cst_66 {dimension_numbers = #tpu.dot_dimension_numbers<[1], [0], [0], [1], [0, 0, 1, 1], [], []>} : vector<8x128xf32>, vector<128x128xf32>, vector<8x128xf32> -> vector<8x128xf32>
    %c0_67 = arith.constant 0 : index
    %c0_68 = arith.constant 0 : index
    %173 = vector.load %arg11[%c0_67, %c0_68] : memref<1x128xf32, #tpu.memory_space<vmem>>, vector<1x128xf32>
    %174 = vector.broadcast %173 : vector<1x128xf32> to vector<8x128xf32>
    %175 = arith.addf %172, %174 : vector<8x128xf32>
    %176 = arith.addf %4, %175 : vector<8x128xf32>
    %cst_69 = arith.constant dense<0.000000e+00> : vector<8xf32>
    %177 = vector.multi_reduction <add>, %176, %cst_69 [1] : vector<8x128xf32> to vector<8xf32>
    %178 = vector.shape_cast %177 : vector<8xf32> to vector<8x1xf32>
    %179 = arith.mulf %176, %176 : vector<8x128xf32>
    %cst_70 = arith.constant dense<0.000000e+00> : vector<8xf32>
    %180 = vector.multi_reduction <add>, %179, %cst_70 [1] : vector<8x128xf32> to vector<8xf32>
    %181 = vector.shape_cast %180 : vector<8xf32> to vector<8x1xf32>
    %cst_71 = arith.constant 7.812500e-03 : f32
    %182 = vector.broadcast %cst_71 : f32 to vector<8x1xf32>
    %183 = arith.mulf %178, %182 : vector<8x1xf32>
    %cst_72 = arith.constant 7.812500e-03 : f32
    %184 = vector.broadcast %cst_72 : f32 to vector<8x1xf32>
    %185 = arith.mulf %181, %184 : vector<8x1xf32>
    %186 = arith.mulf %183, %183 : vector<8x1xf32>
    %187 = arith.subf %185, %186 : vector<8x1xf32>
    %188 = vector.broadcast %183 : vector<8x1xf32> to vector<8x128xf32>
    %189 = arith.subf %176, %188 : vector<8x128xf32>
    %cst_73 = arith.constant 9.99999974E-6 : f32
    %190 = vector.broadcast %cst_73 : f32 to vector<8x1xf32>
    %191 = arith.addf %187, %190 : vector<8x1xf32>
    %192 = math.rsqrt %191 : vector<8x1xf32>
    %193 = vector.broadcast %192 : vector<8x1xf32> to vector<8x128xf32>
    %194 = arith.mulf %189, %193 : vector<8x128xf32>
    %c0_74 = arith.constant 0 : index
    %c0_75 = arith.constant 0 : index
    %195 = vector.load %arg12[%c0_74, %c0_75] : memref<1x128xf32, #tpu.memory_space<vmem>>, vector<1x128xf32>
    %196 = vector.broadcast %195 : vector<1x128xf32> to vector<8x128xf32>
    %197 = arith.mulf %194, %196 : vector<8x128xf32>
    %c0_76 = arith.constant 0 : index
    %c0_77 = arith.constant 0 : index
    %198 = vector.load %arg13[%c0_76, %c0_77] : memref<1x128xf32, #tpu.memory_space<vmem>>, vector<1x128xf32>
    %199 = vector.broadcast %198 : vector<1x128xf32> to vector<8x128xf32>
    %200 = arith.addf %197, %199 : vector<8x128xf32>
    %c0_78 = arith.constant 0 : index
    %c0_79 = arith.constant 0 : index
    %c0_80 = arith.constant 0 : index
    %201 = vector.load %arg14[%c0_78, %c0_79, %c0_80] : memref<1x8x128xf32, #tpu.memory_space<vmem>>, vector<1x8x128xf32>
    %202 = vector.shape_cast %201 : vector<1x8x128xf32> to vector<8x128xf32>
    %203 = vector.shape_cast %200 : vector<8x128xf32> to vector<1x8x128xf32>
    tpu.vector_store %arg14[%c0_78, %c0_79, %c0_80], %203 {strides = array<i32>} : memref<1x8x128xf32, #tpu.memory_space<vmem>>, vector<1x8x128xf32>,
    return
  }
  func.func @transform_0(%arg0: i32, %arg1: i32) -> (i32, i32, i32) {
    %c0_i32 = arith.constant 0 : i32
    %c0_i32_0 = arith.constant 0 : i32
    return %arg0, %arg1, %c0_i32 : i32, i32, i32
  }
  func.func @transform_1(%arg0: i32, %arg1: i32) -> (i32, i32, i32) {
    %c0_i32 = arith.constant 0 : i32
    %c0_i32_0 = arith.constant 0 : i32
    %c0_i32_1 = arith.constant 0 : i32
    return %arg0, %c0_i32, %c0_i32_0 : i32, i32, i32
  }
  func.func @transform_2(%arg0: i32, %arg1: i32) -> (i32, i32) {
    %c0_i32 = arith.constant 0 : i32
    %c0_i32_0 = arith.constant 0 : i32
    %c0_i32_1 = arith.constant 0 : i32
    return %c0_i32, %c0_i32_0 : i32, i32
  }
  func.func @transform_3(%arg0: i32, %arg1: i32) -> (i32, i32) {
    %c0_i32 = arith.constant 0 : i32
    %c0_i32_0 = arith.constant 0 : i32
    %c0_i32_1 = arith.constant 0 : i32
    return %c0_i32, %c0_i32_0 : i32, i32
  }
  func.func @transform_4(%arg0: i32, %arg1: i32) -> (i32, i32) {
    %c0_i32 = arith.constant 0 : i32
    %c0_i32_0 = arith.constant 0 : i32
    %c0_i32_1 = arith.constant 0 : i32
    return %c0_i32, %c0_i32_0 : i32, i32
  }
  func.func @transform_5(%arg0: i32, %arg1: i32) -> (i32, i32) {
    %c0_i32 = arith.constant 0 : i32
    %c0_i32_0 = arith.constant 0 : i32
    %c0_i32_1 = arith.constant 0 : i32
    return %c0_i32, %c0_i32_0 : i32, i32
  }
  func.func @transform_6(%arg0: i32, %arg1: i32) -> (i32, i32) {
    %c0_i32 = arith.constant 0 : i32
    %c0_i32_0 = arith.constant 0 : i32
    %c0_i32_1 = arith.constant 0 : i32
    return %c0_i32, %c0_i32_0 : i32, i32
  }
  func.func @transform_7(%arg0: i32, %arg1: i32) -> (i32, i32) {
    %c0_i32 = arith.constant 0 : i32
    %c0_i32_0 = arith.constant 0 : i32
    %c0_i32_1 = arith.constant 0 : i32
    return %c0_i32, %c0_i32_0 : i32, i32
  }
  func.func @transform_8(%arg0: i32, %arg1: i32) -> (i32, i32) {
    %c0_i32 = arith.constant 0 : i32
    %c0_i32_0 = arith.constant 0 : i32
    %c0_i32_1 = arith.constant 0 : i32
    return %c0_i32, %c0_i32_0 : i32, i32
  }
  func.func @transform_9(%arg0: i32, %arg1: i32) -> (i32, i32) {
    %c0_i32 = arith.constant 0 : i32
    %c0_i32_0 = arith.constant 0 : i32
    %c0_i32_1 = arith.constant 0 : i32
    return %c0_i32, %c0_i32_0 : i32, i32
  }
  func.func @transform_10(%arg0: i32, %arg1: i32) -> (i32, i32) {
    %c0_i32 = arith.constant 0 : i32
    %c0_i32_0 = arith.constant 0 : i32
    %c0_i32_1 = arith.constant 0 : i32
    return %c0_i32, %c0_i32_0 : i32, i32
  }
  func.func @transform_11(%arg0: i32, %arg1: i32) -> (i32, i32) {
    %c0_i32 = arith.constant 0 : i32
    %c0_i32_0 = arith.constant 0 : i32
    %c0_i32_1 = arith.constant 0 : i32
    return %c0_i32, %c0_i32_0 : i32, i32
  }
  func.func @transform_12(%arg0: i32, %arg1: i32) -> (i32, i32, i32) {
    %c0_i32 = arith.constant 0 : i32
    %c0_i32_0 = arith.constant 0 : i32
    return %arg0, %arg1, %c0_i32 : i32, i32, i32
  }
}

</mosaic_0001>

<bundles_post_ra>
// kernel: tpu_custom_call.1
= control target key start
LH: loop header
LB: loop body
LE: loop exit
PB: predicated region body
PF: predicated region fallthrough
CT: control target
= control target key end

     0   :  { %s4230_s0 = inlined_call_operand.hbm [shape: f32[2,16,128], index: 0, kind: input, shape index: {}]   ;;  %s4231_s1 = inlined_call_operand.hbm [shape: f32[2,16,128], index: 1, kind: input, shape index: {}]   ;;  %s4232_s2 = inlined_call_operand.hbm [shape: f32[128,128], index: 2, kind: input, shape index: {}]   ;;  %s4233_s3 = inlined_call_operand.vmem [shape: f32[1,128], index: 3, kind: input, shape index: {}]   ;;  %s4234_s4 = inlined_call_operand.hbm [shape: f32[128,128], index: 4, kind: input, shape index: {}]   ;;  %s4235_s5 = inlined_call_operand.vmem [shape: f32[1,128], index: 5, kind: input, shape index: {}]   ;;  %s4236_s6 = inlined_call_operand.hbm [shape: f32[128,128], index: 6, kind: input, shape index: {}]   ;;  %s4237_s7 = inlined_call_operand.vmem [shape: f32[1,128], index: 7, kind: input, shape index: {}]   ;;  %s4238_s8 = inlined_call_operand.hbm [shape: f32[128,128], index: 8, kind: input, shape index: {}]   ;;  %s4239_s9 = inlined_call_operand.vmem [shape: f32[1,128], index: 9, kind: input, shape index: {}]   ;;  %s4240_s10 = inlined_call_operand.vmem [shape: f32[1,128], index: 10, kind: input, shape index: {}]   ;;  %s4241_s11 = inlined_call_operand.vmem [shape: f32[1,128], index: 11, kind: input, shape index: {}]   ;;  %s4242_s12 = inlined_call_operand.hbm [shape: f32[2,16,128], index: 12, kind: output, shape index: {}]  }
   0x1   :  { %4256 = sst [smem:[#allocation33_spill]] %s4230_s0 }
   0x2   :  { %4257 = sst [smem:[#allocation34_spill]] %s4232_s2 }
   0x3   :  { %4258 = sst [smem:[#allocation35_spill]] %s4233_s3 }
   0x4   :  { %4259 = sst [smem:[#allocation36_spill]] %s4234_s4 }
   0x5   :  { %4260 = sst [smem:[#allocation37_spill]] %s4236_s6 }
   0x6   :  { %4261 = sst [smem:[#allocation38_spill]] %s4238_s8 }
   0x7   :  { %4262 = sst [smem:[#allocation39_spill]] %s4239_s9 }
   0x8   :  { %4263 = sst [smem:[#allocation40_spill]] %s4240_s10 }
   0x9   :  { %4264 = sst [smem:[#allocation41_spill]] %s4241_s11 }
   0xa   :  { %4265 = sst [smem:[#allocation42_spill]] %s4242_s12 }
   0xb   :  { %17 = vsyncpa [#allocation6], 0 }
   0xc   :  { %19 = vsyncpa [#allocation6 + $0x1], 0 }
   0xd   :  { %20 = vsyncpa [#allocation9], 0 }
   0xe   :  { %22 = vsyncpa [#allocation9 + $0x1], 0 }
   0xf   :  { %23 = vsyncpa [#allocation12], 0 }
  0x10   :  { %24 = vsyncpa [#allocation15], 0 }
  0x11   :  { %25 = vsyncpa [#allocation7], 0 }
  0x12   :  { %27 = vsyncpa [#allocation7 + $0x1], 0  ;;  %s3583_s21 = smov 0   ;;  %s3585_s22 = smov 0  }
  0x13   :  { %s3587_s23 = smov 0   ;;  %s3589_s24 = smov 0  }
  0x14   :  { %s3591_s25 = smov 0   ;;  %s3593_s26 = smov 0  }
  0x15   :  { %s3595_s27 = smov 0   ;;  %s3597_s28 = smov 0  }
  0x16   :  { %s3599_s29 = smov 0   ;;  %s3601_s30 = smov 0  }
  0x17   :  { %s3603_s13 = smov 0  }
  0x18 LB: > { %4266 = sst [smem:[#allocation23_spill]] %s3466_s23  ;;  %s3639_s14 = sadd.s32 4294967295, %s3498_s13   ;;  %s3498_s13 = sphi %s3603_s13, %s33_s13   ;;  %s3494_s30 = sphi %s3601_s30, %s4326_s30   ;;  %s3490_s29 = sphi %s3599_s29, %s4318_s29   ;;  %s3486_s28 = sphi %s3597_s28, %s4325_s28   ;;  %s3482_s27 = sphi %s3595_s27, %s4317_s27   ;;  %s3478_s26 = sphi %s3593_s26, %s4324_s26   ;;  %s3474_s25 = sphi %s3591_s25, %s4323_s25   ;;  %s3470_s24 = sphi %s3589_s24, %s4322_s24   ;;  %s3466_s23 = sphi %s3587_s23, %s4314_s23   ;;  %s3462_s22 = sphi %s3585_s22, %s4321_s22   ;;  %s3458_s21 = sphi %s3583_s21, %s4320_s21  }
  0x19   : > { %4267 = sst [smem:[#allocation24_spill]] %s3470_s24  ;;  %p2572_p0 = scmp.ge.s32.totalorder %s3498_s13, 1 }
  0x1a   : > { %4268 = sst [smem:[#allocation25_spill]] %s3478_s26  ;;  %p4251_p1 = scmp.eq.s32.totalorder %s3639_s14, 0 }
  0x1b   : > { %4269 = sst [smem:[#allocation26_spill]] %s3486_s28  ;;  %p342_p2 = scmp.lt.s32.totalorder %s3498_s13, 5 }
  0x1c   : > { %4270 = sst [smem:[#allocation27_spill]] %s3490_s29  ;;  %s3500_s16 = smov [#allocation10]  }
  0x1d   : > { %p3644_p3 = pnand %p2572_p0, %p342_p2  ;;  %s354_s17 = sshll.u32 %s3500_s16, 4  ;;  %s355_s17 = int_to_ptr.vmem [resolvable:$true] %s354_s17 }
  0x1e   : > { %s3501_s19 = smov [#allocation11]   ;;  %s3502_s12 = smov [#allocation13]  }
  0x1f   : > { %p3031_p4 = pneg %p3644_p3  ;;  %s370_s20 = sshll.u32 %s3501_s19, 4  ;;  %s371_s20 = int_to_ptr.vmem [resolvable:$true] %s370_s20 }
  0x20   : > { %s386_s11 = sshll.u32 %s3502_s12, 4  ;;  %s3213_s10 = scalar_lea.vmem %s355_s17, 2048  ;;  %s387_s11 = int_to_ptr.vmem [resolvable:$true] %s386_s11 }
  0x21   : > { %p3652_p5 = pnand %p3031_p4, %p4251_p1  ;;  %p3214_p7 = scmp.ne.s32.totalorder %s355_s17, %s3213_s10 }
  0x22   : > { %p3221_p10 = scmp.lt.s32.totalorder %s355_s17, %s355_s17  ;;  %p3222_p11 = scmp.lt.s32.totalorder %s3213_s10, %s3213_s10 }
  0x23   : > { %p3204_p6 = pneg %p3652_p5 }
  0x24   : > { %p3223_p12 = por %p3222_p11, %p3221_p10 }
  0x25   : > { %p3216_p8 = pnand %p3214_p7, %p3204_p6 }
  0x27   : > { %p3217_p9 = pneg %p3216_p8 }
  0x29   : > { %p3224_p13 = pnand %p3223_p12, %p3217_p9 }
  0x2b   : > { %3227 = shalt.err (!%p3224_p13)
}
  0x2c   : > { %s4244_s16 = smov 128   ;;  %s4245_s19 = smov 8  }
  0x2d   : > { %s4273_s2 = sld [smem:[#allocation34_spill]]  ;;  %s3239_s9 = scalar_lea.vmem %s371_s20, 2048 }
  0x2e   : > { %p3240_p0 = scmp.ne.s32.totalorder %s371_s20, %s3239_s9  ;;  %p3247_p7 = scmp.lt.s32.totalorder %s371_s20, %s371_s20 }
  0x2f   : > { %p3248_p8 = scmp.lt.s32.totalorder %s3239_s9, %s3239_s9 }
  0x30   : > { %p3242_p2 = pnand %p3240_p0, %p3204_p6 }
  0x31   : > { %p3249_p9 = por %p3248_p8, %p3247_p7 }
  0x32   : > { %p3243_p4 = pneg %p3242_p2 }
  0x33   : > { %3034 = dma.hbm_to_vmem [thread:$0]  (!%p3652_p5), %s4273_s2, 2048, %s355_s17, [#allocation9], %s4244_s16, %s4244_s16, %s4245_s19  }
  0x34   : > { %p3250_p10 = pnand %p3249_p9, %p3243_p4 }
  0x36   : > { %3253 = shalt.err (!%p3250_p10)
}
  0x37   : > { %s4274_s4 = sld [smem:[#allocation36_spill]]  ;;  %s3265_s28 = scalar_lea.vmem %s387_s11, 2048 }
  0x38   : > { %p3266_p11 = scmp.ne.s32.totalorder %s387_s11, %s3265_s28  ;;  %p3273_p0 = scmp.lt.s32.totalorder %s387_s11, %s387_s11 }
  0x39   : > { %p3274_p2 = scmp.lt.s32.totalorder %s3265_s28, %s3265_s28 }
  0x3a   : > { %p3268_p12 = pnand %p3266_p11, %p3204_p6 }
  0x3b   : > { %p3275_p4 = por %p3274_p2, %p3273_p0 }
  0x3c   : > { %p3269_p13 = pneg %p3268_p12 }
  0x3d   : > { %3037 = dma.hbm_to_vmem [thread:$0]  (!%p3652_p5), %s4274_s4, 2048, %s371_s20, [#allocation12], %s4244_s16, %s4244_s16, %s4245_s19  }
  0x3e   : > { %p3276_p7 = pnand %p3275_p4, %p3269_p13 }
  0x40   : > { %3279 = shalt.err (!%p3276_p7)
}
  0x41   : > { %s4275_s6 = sld [smem:[#allocation37_spill]]  ;;  %s3505_s17 = smov [#allocation14]  }
  0x42   : > { %s402_s20 = sshll.u32 %s3505_s17, 4  ;;  %s403_s20 = int_to_ptr.vmem [resolvable:$true] %s402_s20 }
  0x43   : > { %s3291_s12 = scalar_lea.vmem %s403_s20, 2048  ;;  %p3299_p11 = scmp.lt.s32.totalorder %s403_s20, %s403_s20 }
  0x44   : > { %p3292_p8 = scmp.ne.s32.totalorder %s403_s20, %s3291_s12  ;;  %p3300_p12 = scmp.lt.s32.totalorder %s3291_s12, %s3291_s12 }
  0x46   : > { %p3294_p9 = pnand %p3292_p8, %p3204_p6  ;;  %p3301_p13 = por %p3300_p12, %p3299_p11 }
  0x47   : > { %3040 = dma.hbm_to_vmem [thread:$0]  (!%p3652_p5), %s4275_s6, 2048, %s387_s11, [#allocation12], %s4244_s16, %s4244_s16, %s4245_s19  }
  0x48   : > { %p3295_p10 = pneg %p3294_p9 }
  0x4a   : > { %p3302_p0 = pnand %p3301_p13, %p3295_p10 }
  0x4c   : > { %3305 = shalt.err (!%p3302_p0)
}
  0x4d   : > { %s4276_s8 = sld [smem:[#allocation38_spill]]  ;;  %s2571_s18 = sadd.s32 4294967294, %s3498_s13  }
  0x4e   : > { %s42_s28 = sadd.s32 1, %s3490_s29  ;;  %s45_s3 = sadd.s32 1, %s3494_s30 }
  0x4f   : > { %p43_p6 = scmp.ge.s32.totalorder %s42_s28, 2  ;;  %s54_s9 = sadd.s32 1, %s3478_s26 }
  0x50   : > { %p61_p2 = scmp.ne.s32.totalorder %s3478_s26, %s3474_s25  ;;  %p4246_p7 = scmp.ne.s32.totalorder %s3474_s25, %s3470_s24 }
  0x51   : > { %s4328_s28 = smov (%p43_p6, %s42_s28), 0  ;;  %s4330_s3 = smov (!%p43_p6, %s45_s3), %s3494_s30 }
  0x52   : > { %4277 = sst [smem:[#allocation28_spill]] %s4328_s28  ;;  %s50_s17 = ssub.s32 %s3490_s29, %s4328_s28 }
  0x53   : > { %3043 = dma.hbm_to_vmem [thread:$0]  (!%p3652_p5), %s4276_s8, 2048, %s403_s20, [#allocation15], %s4244_s16, %s4244_s16, %s4245_s19  }
  0x54   : > { %p62_p5 = scmp.eq.s32.totalorder %s3498_s13, 0  ;;  %p47_p4 = scmp.ge.s32.totalorder %s4330_s3, 2 }
  0x55   : > { %s80_s12 = sadd.s32 1, %s3466_s23  ;;  %p3733_p9 = por %p4251_p1, %p4246_p7 }
  0x56   : > { %p3721_p8 = por %p62_p5, %p61_p2  ;;  %s4332_s3 = smov (%p47_p4, %s4330_s3), 0 }
  0x57   : > { %4279 = sst [smem:[#allocation29_spill]] %s4332_s3  ;;  %p87_p10 = scmp.ne.s32.totalorder %s3466_s23, %s3462_s22 }
  0x58   : > { %s49_s10 = ssub.s32 %s3494_s30, %s4332_s3  ;;  %p93_p11 = scmp.ne.s32.totalorder %s3462_s22, %s3458_s21 }
  0x59   : > { %s51_s16 = sor.u32 %s50_s17, %s49_s10  ;;  %p78_p12 = scmp.eq.s32.totalorder %s49_s10, 0 }
  0x5a   : > { %p52_p13 = scmp.eq.s32.totalorder %s51_s16, 0  ;;  %p3745_p0 = por %p87_p10, %p62_p5 }
  0x5b   : > { %s3750_s2 = scalar_select %p78_p12, %s3466_s23, %s80_s12  }
  0x5c   : > { %s3753_s4 = scalar_select %p52_p13, %s3478_s26, %s54_s9  }
  0x5d   : > { %4282 = sst [smem:[#allocation30_spill]] %s3750_s2  ;;  %p3757_p6 = por %p93_p11, %p4251_p1 }
  0x5e   : > { %4283 = sst [smem:[#allocation31_spill]] %s3753_s4  ;;  %p329_p4 = scmp.eq.s32.totalorder %s3639_s14, 3 }
  0x5f   : > { %p335_p7 = scmp.eq.s32.totalorder %s2571_s18, 3  ;;  %p3059_p5 = scmp.lt.s32.totalorder %s3498_s13, 4 }
  0x60   : > { %p3766_p10 = por %p329_p4, %p61_p2  ;;  %s425_s16 = sand.u32 1, %s3478_s26  }
  0x61   : > { %p4286_p12 = scmp.ne.s32.totalorder %s3474_s25, %s3470_s24  ;;  %s2578_s17 = sshll.u32 %s425_s16, 3 }
  0x62   : > { %s4285_s21 = scalar_select %p3766_p10, 1, 0 }
  0x63   : > { %p3774_p13 = por %p335_p7, %p4286_p12  ;;  %s2579_s12 = sshll.u32 %s3494_s30, 1 }
  0x64   : > { %s434_s10 = sadd.s32 %s3490_s29, %s2579_s12  ;;  %s429_s3 = scalar_lea.vmem [#allocation5], %s2578_s17 }
  0x65   : > { %s4287_s9 = scalar_select %p3774_p13, 1, 0 }
  0x66   : > { %s2580_s8 = sshll.u32 %s434_s10, 7  ;;  %s438_s28 = sshll.u32 %s429_s3, 4  ;;  %s439_s28 = int_to_ptr.vmem [resolvable:$true] %s438_s28 }
  0x67   : > { %4288 = sst [smem:[#allocation32_spill]] %s4287_s9  ;;  %p3787_p2 = pnand %p3059_p5, %p3721_p8 }
  0x68   : > { %s4289_s0 = sld [smem:[#allocation33_spill]]  ;;  %p3795_p7 = pnand %p3059_p5, %p3745_p0 }
  0x69   : > { %s445_s17 = sand.u32 1, %s3498_s13   ;;  %s447_s3 = sand.u32 1, %s3466_s23  }
  0x6a   : > { %s426_s12 = scalar_lea.sflag [#allocation6], %s425_s16  ;;  %p3308_p11 = pneg %p3787_p2 }
  0x6b   : > { %s3319_s4 = scalar_lea.vmem %s439_s28, 128 }
  0x6c   : > { %p3320_p4 = scmp.ne.s32.totalorder %s439_s28, %s3319_s4 }
  0x6e   : > { %s436_s2 = scalar_lea.hbm %s4289_s0, %s2580_s8  ;;  %p3322_p12 = pnand %p3320_p4, %p3308_p11 }
  0x6f   : > { %s3506_s8 = smov [#allocation5]  }
  0x70   : > { %p3323_p1 = pneg %p3322_p12  ;;  %s3324_s20 = sshll.u32 %s3506_s8, 4  ;;  %s3325_s20 = int_to_ptr.vmem [resolvable:$false] %s3324_s20 }
  0x71   : > { %s3326_s10 = scalar_lea.vmem %s3325_s20, 256  ;;  %p3327_p8 = scmp.lt.s32.totalorder %s439_s28, %s3325_s20 }
  0x72   : > { %p3328_p13 = scmp.lt.s32.totalorder %s3326_s10, %s3319_s4 }
  0x74   : > { %p3329_p10 = por %p3328_p13, %p3327_p8 }
  0x76   : > { %p3330_p0 = pnand %p3329_p10, %p3323_p1 }
  0x78   : > { %3333 = shalt.err (!%p3330_p0)
}
  0x79   : > { %3047 = dma.hbm_to_vmem [thread:$0]  (!%p3787_p2), %s436_s2, 128, %s439_s28, %s426_s12  }
  0x7a   : > { %s2581_s19 = sshll.u32 %s447_s3, 4  ;;  %s2638_s16 = sshll.u32 %s3494_s30, 8 }
  0x7b   : > { %s455_s29 = scalar_lea.hbm %s4231_s1, %s2638_s16  ;;  %s449_s23 = scalar_lea.vmem [#allocation8], %s2581_s19 }
  0x7c   : > { %s456_s8 = sshll.u32 %s449_s23, 4  ;;  %s446_s24 = scalar_lea.sflag [#allocation9], %s445_s17  ;;  %s457_s8 = int_to_ptr.vmem [resolvable:$true] %s456_s8 }
  0x7d   : > { %p3336_p5 = pneg %p3795_p7  ;;  %s3347_s4 = scalar_lea.vmem %s457_s8, 256 }
  0x7e   : > { %p3348_p1 = scmp.ne.s32.totalorder %s457_s8, %s3347_s4  ;;  %s3507_s26 = smov [#allocation8]  }
  0x7f   : > { %s3352_s20 = sshll.u32 %s3507_s26, 4  ;;  %s3353_s20 = int_to_ptr.vmem [resolvable:$false] %s3352_s20 }
  0x80   : > { %p3350_p10 = pnand %p3348_p1, %p3336_p5  ;;  %s3354_s2 = scalar_lea.vmem %s3353_s20, 512 }
  0x81   : > { %p3355_p2 = scmp.lt.s32.totalorder %s457_s8, %s3353_s20  ;;  %p3356_p11 = scmp.lt.s32.totalorder %s3354_s2, %s3347_s4 }
  0x82   : > { %p3351_p13 = pneg %p3350_p10 }
  0x83   : > { %p3357_p4 = por %p3356_p11, %p3355_p2 }
  0x85   : > { %p3358_p12 = pnand %p3357_p4, %p3351_p13 }
  0x87   : > { %3361 = shalt.err (!%p3358_p12)
}
  0x88   : > { %s4292_s0 = smov 8   ;;  %s4293_s23 = smov 128  }
  0x89   : > { %3050 = dma.hbm_to_vmem [thread:$0]  (!%p3795_p7), %s455_s29, 256, %s457_s8, %s446_s24, %s4293_s23, %s4293_s23, %s4292_s0  }
  0x8a   : > { %468 = sbr.rel (%p3644_p3) target bundleno = 3132 (0xc3c), region = 68  ;;  %s3819_s28 = sand.u32 (!%p3644_p3), 1, %s3474_s25  }
  0x8b   : > { %s2585_s17 = sshll.u32 (!%p3644_p3), %s3819_s28, 3  ;;  %s471_s3 = scalar_lea.sflag (!%p3644_p3), [#allocation6], %s3819_s28 }
  0x8c   : > { %s3823_s12 = scalar_lea.vmem (!%p3644_p3), [#allocation5], %s2585_s17 }
  0x8f   : > { %3433 = dma.done.wait (%p3733_p9), %s471_s3, 128  }
  0x90   : > { %3435 = vsyncadd (%p3733_p9), %s471_s3, 4294967168  ;;  %s479_s24 = sand.u32 1, %s3639_s14   ;;  %s481_s29 = sand.u32 1, %s3462_s22  }
  0x91   : > { %s3831_s15 = sshll.u32 %s481_s29, 4  ;;  %s480_s9 = scalar_lea.sflag [#allocation9], %s479_s24 }
  0x92   : > { %s483_s10 = scalar_lea.vmem [#allocation8], %s3831_s15 }
  0x93   : > { %3437 = dma.done.wait (%p3757_p6), %s480_s9, 256  }
  0x94   : > { %3439 = vsyncadd (%p3757_p6), %s480_s9, 4294967040  ;;  %p4294_p3 = scmp.eq.s32.totalorder %s3639_s14, 0 }
  0x96   : > { %3441 = dma.done.wait (%p4294_p3), [#allocation9], 2048   ;;  %p4295_p9 = pmov %p4294_p3 }
  0x97   : > { %p4296_p7 = pmov %p4294_p3 }
  0x98   : > { %3443 = vsyncadd (%p4295_p9), [#allocation9], 4294965248 }
  0x99   : > { %3445 = dma.done.wait (%p4296_p7), [#allocation12], 4096   ;;  %p4297_p8 = pmov %p4294_p3 }
  0x9a   : > { %p4298_p0 = pmov %p4294_p3 }
  0x9b   : > { %3447 = vsyncadd (%p4297_p8), [#allocation12], 4294963200 }
  0x9c   : > { %3449 = dma.done.wait (%p4298_p0), [#allocation15], 2048   ;;  %p4299_p5 = pmov %p4298_p0 }
  0x9d   : > { %s3850_s6 = scalar_lea.vmem [#allocation16], %s2585_s17  ;;  %p2592_p6 = scmp.ne.s32.totalorder %s3482_s27, 0 }
  0x9e   : > { %3451 = vsyncadd (%p4299_p5), [#allocation15], 4294965248 }
  0x9f   : > { %548 = sbr.rel (%p2592_p6) target bundleno = 397 (0x18d), region = 96 }
  0xa4   : > { %v566_v0 = vld [vmem:[#allocation11 + $0x78] sm:$0xff]  ;;  %v565_v2 = vld [vmem:[#allocation11 + $0x70] sm:$0xff]  ;;  %v564_v4 = vld [vmem:[#allocation11 + $0x68] sm:$0xff] }
  0xa5   : > { %v664_v1 = vld [vmem:[#allocation13 + $0x78] sm:$0xff]  ;;  %2757 = vmatprep.subr.mxu0 %v566_v0  ;;  %v663_v3 = vld [vmem:[#allocation13 + $0x70] sm:$0xff]  ;;  %v662_v5 = vld [vmem:[#allocation13 + $0x68] sm:$0xff] }
  0xa6   : > { %2792 = vmatprep.subr.mxu1 %v664_v1  ;;  %2758 = vmatpush3.msra.mxu0 %v566_v0  ;;  %v563_v6 = vld [vmem:[#allocation11 + $0x60] sm:$0xff]  ;;  %v562_v8 = vld [vmem:[#allocation11 + $0x58] sm:$0xff]  ;;  %v561_v10 = vld [vmem:[#allocation11 + $0x50] sm:$0xff] }
  0xa7   : > { %2793 = vmatpush3.msra.mxu1 %v664_v1  ;;  %2759 = vmatprep.subr.mxu0 %v565_v2  ;;  %v661_v7 = vld [vmem:[#allocation13 + $0x60] sm:$0xff]  ;;  %v660_v9 = vld [vmem:[#allocation13 + $0x58] sm:$0xff]  ;;  %v659_v11 = vld [vmem:[#allocation13 + $0x50] sm:$0xff] }
  0xa8   : > { %2794 = vmatprep.subr.mxu1 %v663_v3  ;;  %2760 = vmatpush3.msra.mxu0 %v565_v2  ;;  %v560_v12 = vld [vmem:[#allocation11 + $0x48] sm:$0xff]  ;;  %v559_v14 = vld [vmem:[#allocation11 + $0x40] sm:$0xff]  ;;  %v558_v16 = vld [vmem:[#allocation11 + $0x38] sm:$0xff] }
  0xa9   : > { %2795 = vmatpush3.msra.mxu1 %v663_v3  ;;  %2761 = vmatprep.subr.mxu0 %v564_v4  ;;  %v658_v13 = vld [vmem:[#allocation13 + $0x48] sm:$0xff]  ;;  %v657_v15 = vld [vmem:[#allocation13 + $0x40] sm:$0xff]  ;;  %v656_v17 = vld [vmem:[#allocation13 + $0x38] sm:$0xff] }
  0xaa   : > { %2796 = vmatprep.subr.mxu1 %v662_v5  ;;  %2762 = vmatpush3.msra.mxu0 %v564_v4  ;;  %v557_v18 = vld [vmem:[#allocation11 + $0x30] sm:$0xff]  ;;  %v556_v20 = vld [vmem:[#allocation11 + $0x28] sm:$0xff]  ;;  %v555_v22 = vld [vmem:[#allocation11 + $0x20] sm:$0xff] }
  0xab   : > { %2797 = vmatpush3.msra.mxu1 %v662_v5  ;;  %2763 = vmatprep.subr.mxu0 %v563_v6  ;;  %v655_v19 = vld [vmem:[#allocation13 + $0x30] sm:$0xff]  ;;  %v654_v21 = vld [vmem:[#allocation13 + $0x28] sm:$0xff]  ;;  %v653_v23 = vld [vmem:[#allocation13 + $0x20] sm:$0xff] }
  0xac   : > { %2798 = vmatprep.subr.mxu1 %v661_v7  ;;  %2764 = vmatpush3.msra.mxu0 %v563_v6  ;;  %v554_v24 = vld [vmem:[#allocation11 + $0x18] sm:$0xff]  ;;  %v553_v26 = vld [vmem:[#allocation11 + $0x10] sm:$0xff]  ;;  %v552_v28 = vld [vmem:[#allocation11 + $0x8] sm:$0xff] }
  0xad   : > { %2799 = vmatpush3.msra.mxu1 %v661_v7  ;;  %2765 = vmatprep.subr.mxu0 %v562_v8  ;;  %v652_v25 = vld [vmem:[#allocation13 + $0x18] sm:$0xff]  ;;  %v651_v27 = vld [vmem:[#allocation13 + $0x10] sm:$0xff]  ;;  %v650_v29 = vld [vmem:[#allocation13 + $0x8] sm:$0xff] }
  0xae   : > { %2800 = vmatprep.subr.mxu1 %v660_v9  ;;  %2766 = vmatpush3.msra.mxu0 %v562_v8  ;;  %v551_v30 = vld [vmem:[#allocation11] sm:$0xff]  ;;  %v550_v33 = vld [vmem:[%s483_s10 + $0x8] sm:$0xff] }
  0xaf   : > { %2801 = vmatpush3.msra.mxu1 %v660_v9  ;;  %2767 = vmatprep.subr.mxu0 %v561_v10  ;;  %v649_v31 = vld [vmem:[#allocation13] sm:$0xff]  ;;  %v2593_v34 = vld [vmem:[%s4235_s5] ss:$0 sm:$0xff] }
  0xb0   : > { %2802 = vmatprep.subr.mxu1 %v659_v11  ;;  %2768 = vmatpush3.msra.mxu0 %v561_v10  ;;  %v549_v32 = vld [vmem:[%s483_s10] sm:$0xff]  ;;  %v2594_v35 = vld [vmem:[%s4237_s7] ss:$0 sm:$0xff] }
  0xb1   : > { %2803 = vmatpush3.msra.mxu1 %v659_v11  ;;  %2769 = vmatprep.subr.mxu0 %v560_v12 }
  0xb2   : > { %2804 = vmatprep.subr.mxu1 %v658_v13  ;;  %2770 = vmatpush3.msra.mxu0 %v560_v12 }
  0xb3   : > { %2805 = vmatpush3.msra.mxu1 %v658_v13  ;;  %2771 = vmatprep.subr.mxu0 %v559_v14 }
  0xb4   : > { %2806 = vmatprep.subr.mxu1 %v657_v15  ;;  %2772 = vmatpush3.msra.mxu0 %v559_v14 }
  0xb5   : > { %2807 = vmatpush3.msra.mxu1 %v657_v15  ;;  %2773 = vmatprep.subr.mxu0 %v558_v16 }
  0xb6   : > { %2808 = vmatprep.subr.mxu1 %v656_v17  ;;  %2774 = vmatpush3.msra.mxu0 %v558_v16 }
  0xb7   : > { %2809 = vmatpush3.msra.mxu1 %v656_v17  ;;  %2775 = vmatprep.subr.mxu0 %v557_v18 }
  0xb8   : > { %2810 = vmatprep.subr.mxu1 %v655_v19  ;;  %2776 = vmatpush3.msra.mxu0 %v557_v18 }
  0xb9   : > { %2811 = vmatpush3.msra.mxu1 %v655_v19  ;;  %2777 = vmatprep.subr.mxu0 %v556_v20 }
  0xba   : > { %2812 = vmatprep.subr.mxu1 %v654_v21  ;;  %2778 = vmatpush3.msra.mxu0 %v556_v20 }
  0xbb   : > { %2813 = vmatpush3.msra.mxu1 %v654_v21  ;;  %2779 = vmatprep.subr.mxu0 %v555_v22 }
  0xbc   : > { %2814 = vmatprep.subr.mxu1 %v653_v23  ;;  %2780 = vmatpush3.msra.mxu0 %v555_v22 }
  0xbd   : > { %2815 = vmatpush3.msra.mxu1 %v653_v23  ;;  %2781 = vmatprep.subr.mxu0 %v554_v24 }
  0xbe   : > { %2816 = vmatprep.subr.mxu1 %v652_v25  ;;  %2782 = vmatpush3.msra.mxu0 %v554_v24 }
  0xbf   : > { %2817 = vmatpush3.msra.mxu1 %v652_v25  ;;  %2783 = vmatprep.subr.mxu0 %v553_v26 }
  0xc0   : > { %2818 = vmatprep.subr.mxu1 %v651_v27  ;;  %2784 = vmatpush3.msra.mxu0 %v553_v26 }
  0xc1   : > { %2819 = vmatpush3.msra.mxu1 %v651_v27  ;;  %2785 = vmatprep.subr.mxu0 %v552_v28 }
  0xc2   : > { %2820 = vmatprep.subr.mxu1 %v650_v29  ;;  %2786 = vmatpush3.msra.mxu0 %v552_v28 }
  0xc3   : > { %2821 = vmatpush3.msra.mxu1 %v650_v29  ;;  %2787 = vmatprep.subr.mxu0 %v551_v30 }
  0xc4   : > { %2822 = vmatprep.subr.mxu1 %v649_v31  ;;  %2788 = vmatpush3.msra.mxu0 %v551_v30 }
  0xc5   : > { %2789 = vmatprep.mubr.f32.mxu0 %v549_v32  ;;  %2823 = vmatpush3.msra.mxu1 %v649_v31 }
  0xc6   : > { %2824 = vmatprep.mubr.f32.mxu1 %v549_v32  ;;  %2790 = vmatmul.mubr.f32.vlgmr.msra.gmra.mxu0 %v550_v33 }
  0xc7   : > { %2825 = vmatmul.mubr.f32.vlgmr.msra.gmra.mxu1 %v550_v33 }
 0x186   : > { %v2791_v36 = vpop.f32.mrf.mxu0 }
 0x187   : > { %v2826_v37 = vpop.f32.mrf.mxu1  ;;  %v646_v38 = vadd.f32 %v2791_v36, %v2593_v34 }
 0x188   : > { %v744_v39 = vadd.f32 %v2826_v37, %v2594_v35  ;;  %v640_v40 = vpop.f32.mrf.mxu0 }
 0x189   : > { %v738_v41 = vpop.f32.mrf.mxu1  ;;  %748 = vst [vmem:[#allocation2 + $0x8] sm:$0xff] %v646_v38  ;;  %v641_v42 = vadd.f32 %v2593_v34, %v640_v40 }
 0x18a   : > { %750 = vst [vmem:[#allocation3] sm:$0xff] %v744_v39  ;;  %v739_v43 = vadd.f32 %v2594_v35, %v738_v41 }
 0x18b   : > { %747 = vst [vmem:[#allocation2] sm:$0xff] %v641_v42 }
 0x18c   : > { %749 = vst [vmem:[#allocation3 + $0x8] sm:$0xff] %v739_v43 }
 0x18d PF: > { %v767_v44 = vld [vmem:[#allocation10 + $0x78] sm:$0xff]  ;;  %v3508_v45 = vmov 0.0   ;;  %v766_v46 = vld [vmem:[#allocation10 + $0x70] sm:$0xff]  ;;  %vm3509_vm0 = vmmov 0   ;;  %v765_v47 = vld [vmem:[#allocation10 + $0x68] sm:$0xff]  ;;  %vm862_vm1 = vcmask 130048   ;;  %v846_v7 = vlaneseq }
 0x18e   : > { %2827 = vmatprep.subr.mxu0 %v3508_v45  ;;  %2859 = vmatprep.mubr.msk.f32.mxu0 %vm3509_vm0, %v3508_v45  ;;  %v764_v48 = vld [vmem:[#allocation10 + $0x60] sm:$0xff]  ;;  %v763_v50 = vld [vmem:[#allocation10 + $0x58] sm:$0xff]  ;;  %v762_v51 = vld [vmem:[#allocation10 + $0x50] sm:$0xff]  ;;  %s3510_s18 = smov 112   ;;  %s4300_s26 = sld [smem:[#allocation35_spill]]  ;;  %vm1207_vm5 = vcmask 261248  }
 0x18f   : > { %2828 = vmatpush3.msra.mxu0 %v767_v44  ;;  %2862 = vmatprep.subr.mxu1 %v3508_v45  ;;  %v761_v52 = vld [vmem:[#allocation10 + $0x48] sm:$0xff]  ;;  %v760_v53 = vld [vmem:[#allocation10 + $0x40] sm:$0xff]  ;;  %v759_v54 = vld [vmem:[#allocation10 + $0x38] sm:$0xff]  ;;  %s2596_s20 = sshll.u32 %s3482_s27, 3  ;;  %v847_v8 = vshrl.u32 %v846_v7, 7  ;;  %v852_v11 = vand.u32 127, %v846_v7 }
 0x190   : > { %2829 = vmatprep.subr.mxu0 %v3508_v45  ;;  %2866 = vmatprep.mubr.msk.f32.mxu1 %vm3509_vm0, %v3508_v45  ;;  %v3871_v49 = vld [vmem:[#allocation2 + $0x8] sm:$0xff]  ;;  %v757_v56 = vld [vmem:[#allocation10 + $0x28] sm:$0xff]  ;;  %v756_v57 = vld [vmem:[#allocation10 + $0x20] sm:$0xff]  ;;  %v849_v9 = vstv %s2596_s20  ;;  %s3511_s2 = smov 96   ;;  %s3512_s0 = smov 80   ;;  %vm1386_vm6 = vcmask 392448  }
 0x191   : > { %2830 = vmatpush3.msra.mxu0 %v766_v46  ;;  %2863 = vmatpush3.xpose.msk.msra.mxu1 %vm862_vm1, %v3871_v49  ;;  %v758_v55 = vld [vmem:[#allocation10 + $0x30] sm:$0xff]  ;;  %v755_v58 = vld [vmem:[#allocation10 + $0x18] sm:$0xff]  ;;  %v753_v60 = vld [vmem:[#allocation10 + $0x8] sm:$0xff]  ;;  %v850_v10 = vadd.s32 %v849_v9, %v847_v8  ;;  %s3513_s23 = smov 64   ;;  %s3514_s17 = smov 48   ;;  %vm1565_vm7 = vcmask 523648  }
 0x192   : > { %2831 = vmatprep.subr.mxu0 %v3508_v45  ;;  %2864 = vmatprep.subr.mxu1 %v3508_v45  ;;  %v754_v59 = vld [vmem:[#allocation10 + $0x10] sm:$0xff]  ;;  %v752_v61 = vld [vmem:[#allocation10] sm:$0xff]  ;;  %v3896_v63 = vld [vmem:[#allocation2] sm:$0xff]  ;;  %s3515_s3 = smov 32   ;;  %vm1744_vm8 = vcmask 654848   ;;  %vm1923_vm9 = vcmask 786048  }
 0x193   : > { %2832 = vmatpush3.msra.mxu0 %v765_v47  ;;  %v3889_v62 = vld [vmem:[%s3823_s12] sm:$0xff]  ;;  %1030 = vrot.lane.b32.xlu1 %v3896_v63, %s3510_s18  ;;  %v3918_v6 = vld [vmem:[#allocation3 + $0x8] sm:$0xff]  ;;  %v2597_v12 = vadd.s32 4294967294, %v850_v10  ;;  %v855_v13 = vadd.s32 2, %v850_v10  ;;  %s3516_s12 = smov 16   ;;  %vm2102_vm10 = vcmask 917248  }
 0x194   : > { %2833 = vmatprep.subr.mxu0 %v3508_v45  ;;  %v2595_v0 = vld [vmem:[%s4300_s26] ss:$0 sm:$0xff]  ;;  %v3914_v5 = vld [vmem:[#allocation3] sm:$0xff]  ;;  %vm2281_vm11 = vcmask 1048448   ;;  %s4303_s15 = sld [smem:[#allocation39_spill]]  ;;  %s2424_s20 = sshll.u32 %s3850_s6, 4  ;;  %s2425_s20 = int_to_ptr.vmem [resolvable:$true] %s2424_s20 }
 0x195   : > { %2834 = vmatpush3.msra.mxu0 %v764_v48  ;;  %2865 = vmatpush3.xpose.msk.msra.mxu1 %vm862_vm1, %v3896_v63  ;;  %vm854_vm2 = vcmp.ge.s32.totalorder %v852_v11, %v2597_v12  ;;  %vm856_vm3 = vcmp.le.s32.totalorder %v852_v11, %v855_v13  ;;  %s4304_s9 = sld [smem:[#allocation26_spill]]  ;;  %p4309_p10 = scmp.ne.s32.totalorder %s4285_s21, 0 }
 0x196   : > { %2835 = vmatprep.subr.mxu0 %v3508_v45  ;;  %2869 = vmatprep.subr.mxu1 %v3508_v45  ;;  %vm3923_vm4 = vmand %vm854_vm2, %vm856_vm3  ;;  %s4305_s16 = sld [smem:[#allocation40_spill]]  ;;  %s3517_s24 = smov [#allocation16]  }
 0x197   : > { %2836 = vmatpush3.msra.mxu0 %v763_v50  ;;  %s4306_s4 = sld [smem:[#allocation41_spill]]  ;;  %s3366_s29 = sshll.u32 %s3517_s24, 4  ;;  %s3367_s29 = int_to_ptr.vmem [resolvable:$false] %s3366_s29 }
 0x198   : > { %2837 = vmatprep.subr.mxu0 %v3508_v45  ;;  %p3369_p11 = scmp.lt.s32.totalorder %s2425_s20, %s3367_s29 }
 0x199   : > { %2838 = vmatpush3.msra.mxu0 %v762_v51 }
 0x19a   : > { %2839 = vmatprep.subr.mxu0 %v3508_v45 }
 0x19b   : > { %2840 = vmatpush3.msra.mxu0 %v761_v52  ;;  %s2634_s10 = sshll.u32 %s4304_s9, 1 }
 0x19c   : > { %2841 = vmatprep.subr.mxu0 %v3508_v45  ;;  %s2420_s14 = sadd.s32 %s3482_s27, %s2634_s10  ;;  %s2409_s27 = scalar_lea.sflag [#allocation7], %s3819_s28 }
 0x19d   : > { %2842 = vmatpush3.msra.mxu0 %v760_v53  ;;  %s2635_s26 = sshll.u32 %s2420_s14, 7 }
 0x19e   : > { %2843 = vmatprep.subr.mxu0 %v3508_v45 }
 0x19f   : > { %2844 = vmatpush3.msra.mxu0 %v759_v54 }
 0x1a0   : > { %2845 = vmatprep.subr.mxu0 %v3508_v45 }
 0x1a1   : > { %2846 = vmatpush3.msra.mxu0 %v758_v55 }
 0x1a2   : > { %2847 = vmatprep.subr.mxu0 %v3508_v45 }
 0x1a3   : > { %2848 = vmatpush3.msra.mxu0 %v757_v56 }
 0x1a4   : > { %2849 = vmatprep.subr.mxu0 %v3508_v45 }
 0x1a5   : > { %2850 = vmatpush3.msra.mxu0 %v756_v57 }
 0x1a6   : > { %2851 = vmatprep.subr.mxu0 %v3508_v45 }
 0x1a7   : > { %2852 = vmatpush3.msra.mxu0 %v755_v58 }
 0x1a8   : > { %2853 = vmatprep.subr.mxu0 %v3508_v45 }
 0x1a9   : > { %2854 = vmatpush3.msra.mxu0 %v754_v59 }
 0x1aa   : > { %2855 = vmatprep.subr.mxu0 %v3508_v45 }
 0x1ab   : > { %2856 = vmatpush3.msra.mxu0 %v753_v60 }
 0x1ac   : > { %2857 = vmatprep.subr.mxu0 %v3508_v45 }
 0x1ad   : > { %2858 = vmatpush3.msra.mxu0 %v752_v61 }
 0x1ae   : > { %2860 = vmatmul.mubr.f32.vlgmr.msra.gmra.mxu0 %v3889_v62  ;;  %2897 = vmatprep.subr.mxu0 %v3508_v45 }
 0x1af   : > { %2901 = vmatprep.mubr.msk.f32.mxu0 %vm3509_vm0, %v3508_v45 }
 0x205   : > { %v1031_v24 = vpop.permute.xlu1 %1030 }
 0x26e   : > { %v841_v1 = vpop.f32.mrf.mxu0 }
 0x26f   : > { %v842_v2 = vadd.f32 %v2595_v0, %v841_v1 }
 0x270   : > { %v2861_v3 = vpop.f32.mrf.mxu0 }
 0x271   : > { %v3906_v4 = vmul.f32 0.25, %v842_v2 }
 0x273   : > { %1028 = vrot.lane.b32.xlu1 %v3906_v4, %s3510_s18  ;;  %2867 = vmatmul.mubr.msk.f32.vlgmr.msra.gmra.mxu1 %vm862_vm1, %v3906_v4 }
 0x274   : > { %2873 = vmatprep.mubr.msk.f32.mxu1 %vm3509_vm0, %v3508_v45  ;;  %2870 = vmatpush3.msra.mxu1 %v3914_v5 }
 0x275   : > { %2871 = vmatprep.subr.mxu1 %v3508_v45 }
 0x276   : > { %2872 = vmatpush3.msra.mxu1 %v3918_v6 }
 0x277   : > { %2876 = vmatprep.subr.mxu1 %v3508_v45 }
 0x2e5   : > { %v1029_v26 = vpop.permute.xlu1 %1028 }
 0x333   : > { %v938_v15 = vpop.f32.mrf.mxu1 }
 0x334   : > { %v942_v16 = vsel %vm3923_vm4, %v938_v15, -inf }
 0x335   : > { %v2868_v17 = vpop.f32.mrf.mxu1  ;;  %v943_v18 = vsel %vm862_vm1, %v942_v16, -inf }
 0x336   : > { %944 = vmax.xlane.f32.xlu0 %v943_v18 }
 0x34c   : > { %1032 = vrot.lane.b32.xlu0 %v3871_v49, %s3510_s18 }
 0x350   : > { %1124 = vrot.lane.b32.xlu0 %v3914_v5, %s3510_s18 }
 0x354   : > { %1122 = vrot.lane.b32.xlu0 %v3918_v6, %s3510_s18 }
 0x358   : > { %1213 = vrot.lane.b32.xlu0 %v3871_v49, %s3511_s2 }
 0x35c   : > { %1211 = vrot.lane.b32.xlu0 %v3896_v63, %s3511_s2 }
 0x360   : > { %1209 = vrot.lane.b32.xlu0 %v3906_v4, %s3511_s2 }
 0x364   : > { %1390 = vrot.lane.b32.xlu0 %v3896_v63, %s3512_s0 }
 0x368   : > { %1388 = vrot.lane.b32.xlu0 %v3906_v4, %s3512_s0 }
 0x36c   : > { %1571 = vrot.lane.b32.xlu0 %v3871_v49, %s3513_s23 }
 0x370   : > { %1569 = vrot.lane.b32.xlu0 %v3896_v63, %s3513_s23 }
 0x3bf   : > { %v945_v19 = vpop.xlane.xlu0 %944 }
 0x3c0   : > { %v946_v20 = vsub.f32 %v942_v16, %v945_v19 }
 0x3c2   : > { %v947_v21 = vmul.f32 1.442695, %v946_v20 }
 0x3c3   : > { %v1033_v22 = vpop.permute.xlu0 %1032 }
 0x3c4   : > { %3168 = vpow2.f32 %v947_v21 }
 0x3c7   : > { %v1125_v25 = vpop.permute.xlu0 %1124 }
 0x3cb   : > { %v1123_v27 = vpop.permute.xlu0 %1122 }
 0x3cf   : > { %v1214_v36 = vpop.permute.xlu0 %1213 }
 0x3d1   : > { %v3946_v23 = vpop.eup %3168 }
 0x3d2   : > { %2874 = vmatmul.mubr.msk.f32.vlgmr.msra.gmra.mxu1 %vm862_vm1, %v3946_v23 }
 0x3d3   : > { %2877 = vmatpush3.xpose.msk.msra.mxu1 %vm862_vm1, %v1033_v22  ;;  %2880 = vmatprep.mubr.msk.f32.mxu1 %vm3509_vm0, %v3508_v45  ;;  %v1212_v38 = vpop.permute.xlu0 %1211 }
 0x3d4   : > { %2878 = vmatprep.subr.mxu1 %v3508_v45 }
 0x3d7   : > { %2879 = vmatpush3.xpose.msk.msra.mxu1 %vm862_vm1, %v1031_v24  ;;  %v1210_v39 = vpop.permute.xlu0 %1209 }
 0x3d8   : > { %2883 = vmatprep.subr.mxu1 %v3508_v45 }
 0x3da   : > { %2881 = vmatmul.mubr.msk.f32.vlgmr.msra.gmra.mxu1 %vm862_vm1, %v1029_v26 }
 0x3db   : > { %2884 = vmatpush3.msra.mxu1 %v1125_v25  ;;  %2887 = vmatprep.mubr.msk.f32.mxu1 %vm3509_vm0, %v3508_v45  ;;  %v1391_v41 = vpop.permute.xlu0 %1390 }
 0x3dc   : > { %2885 = vmatprep.subr.mxu1 %v3508_v45 }
 0x3dd   : > { %2886 = vmatpush3.msra.mxu1 %v1123_v27 }
 0x3de   : > { %2890 = vmatprep.subr.mxu1 %v3508_v45 }
 0x3df   : > { %v1389_v42 = vpop.permute.xlu0 %1388 }
 0x3e3   : > { %v1572_v44 = vpop.permute.xlu0 %1571 }
 0x3e7   : > { %v1570_v47 = vpop.permute.xlu0 %1569 }
 0x492   : > { %v3965_v28 = vpop.f32.mrf.mxu1 }
 0x494   : > { %v2875_v29 = vpop.f32.mrf.mxu1 }
 0x49a   : > { %v1106_v30 = vpop.f32.mrf.mxu1 }
 0x49b   : > { %v1110_v31 = vsel %vm3923_vm4, %v1106_v30, -inf }
 0x49c   : > { %v2882_v32 = vpop.f32.mrf.mxu1  ;;  %v1111_v33 = vsel %vm862_vm1, %v1110_v31, -inf }
 0x49d   : > { %1112 = vmax.xlane.f32.xlu1 %v1111_v33 }
 0x4ae   : > { %1392 = vrot.lane.b32.xlu1 %v3871_v49, %s3512_s0 }
 0x4b2   : > { %1567 = vrot.lane.b32.xlu1 %v3906_v4, %s3513_s23 }
 0x4b6   : > { %1661 = vrot.lane.b32.xlu1 %v3914_v5, %s3513_s23 }
 0x4ba   : > { %1659 = vrot.lane.b32.xlu1 %v3918_v6, %s3513_s23 }
 0x4be   : > { %1750 = vrot.lane.b32.xlu1 %v3871_v49, %s3514_s17 }
 0x4c2   : > { %1748 = vrot.lane.b32.xlu1 %v3896_v63, %s3514_s17 }
 0x4c6   : > { %1746 = vrot.lane.b32.xlu1 %v3906_v4, %s3514_s17 }
 0x4ca   : > { %1929 = vrot.lane.b32.xlu1 %v3871_v49, %s3515_s3 }
 0x4ce   : > { %1927 = vrot.lane.b32.xlu1 %v3896_v63, %s3515_s3 }
 0x526   : > { %v1113_v34 = vpop.xlane.xlu1 %1112 }
 0x527   : > { %v1114_v35 = vsub.f32 %v1110_v31, %v1113_v34 }
 0x529   : > { %v1115_v37 = vmul.f32 1.442695, %v1114_v35 }
 0x52a   : > { %v1393_v43 = vpop.permute.xlu1 %1392 }
 0x52b   : > { %3170 = vpow2.f32 %v1115_v37 }
 0x52e   : > { %v1568_v46 = vpop.permute.xlu1 %1567 }
 0x532   : > { %v1662_v48 = vpop.permute.xlu1 %1661 }
 0x536   : > { %v1660_v50 = vpop.permute.xlu1 %1659 }
 0x538   : > { %v3984_v40 = vpop.eup %3170 }
 0x539   : > { %2888 = vmatmul.mubr.msk.f32.vlgmr.msra.gmra.mxu1 %vm862_vm1, %v3984_v40  ;;  %v1117_v29 = vsel %vm862_vm1, %v3984_v40, 0.0 }
 0x53a   : > { %2891 = vmatpush3.xpose.msk.msra.mxu1 %vm862_vm1, %v1214_v36  ;;  %2894 = vmatprep.mubr.msk.f32.mxu1 %vm3509_vm0, %v3508_v45  ;;  %v1751_v7 = vpop.permute.xlu1 %1750 }
 0x53b   : > { %2892 = vmatprep.subr.mxu1 %v3508_v45 }
 0x53e   : > { %2893 = vmatpush3.xpose.msk.msra.mxu1 %vm862_vm1, %v1212_v38  ;;  %v1749_v8 = vpop.permute.xlu1 %1748 }
 0x53f   : > { %2904 = vmatprep.subr.mxu1 %v3508_v45 }
 0x541   : > { %2895 = vmatmul.mubr.msk.f32.vlgmr.msra.gmra.mxu1 %vm862_vm1, %v1210_v39 }
 0x542   : > { %2905 = vmatpush3.xpose.msk.msra.mxu1 %vm862_vm1, %v1393_v43  ;;  %2908 = vmatprep.mubr.msk.f32.mxu1 %vm3509_vm0, %v3508_v45 }
 0x543   : > { %2906 = vmatprep.subr.mxu1 %v3508_v45 }
 0x546   : > { %2907 = vmatpush3.xpose.msk.msra.mxu1 %vm862_vm1, %v1391_v41 }
 0x547   : > { %2918 = vmatprep.subr.mxu1 %v3508_v45 }
 0x549   : > { %2909 = vmatmul.mubr.msk.f32.vlgmr.msra.gmra.mxu1 %vm862_vm1, %v1389_v42 }
 0x54a   : > { %2919 = vmatpush3.xpose.msk.msra.mxu1 %vm862_vm1, %v1572_v44  ;;  %2922 = vmatprep.mubr.msk.f32.mxu1 %vm3509_vm0, %v3508_v45 }
 0x54b   : > { %2920 = vmatprep.subr.mxu1 %v3508_v45 }
 0x54e   : > { %2921 = vmatpush3.xpose.msk.msra.mxu1 %vm862_vm1, %v1570_v47 }
 0x54f   : > { %2925 = vmatprep.subr.mxu1 %v3508_v45 }
 0x551   : > { %2923 = vmatmul.mubr.msk.f32.vlgmr.msra.gmra.mxu1 %vm862_vm1, %v1568_v46 }
 0x552   : > { %2926 = vmatpush3.msra.mxu1 %v1662_v48  ;;  %2929 = vmatprep.mubr.msk.f32.mxu1 %vm3509_vm0, %v3508_v45 }
 0x553   : > { %2927 = vmatprep.subr.mxu1 %v3508_v45 }
 0x554   : > { %2928 = vmatpush3.msra.mxu1 %v1660_v50 }
 0x555   : > { %2932 = vmatprep.subr.mxu1 %v3508_v45 }
 0x5f9   : > { %v4017_v51 = vpop.f32.mrf.mxu1 }
 0x5fb   : > { %v2889_v52 = vpop.f32.mrf.mxu1 }
 0x601   : > { %v1287_v53 = vpop.f32.mrf.mxu1 }
 0x602   : > { %v4036_v61 = vsel %vm3923_vm4, %v1287_v53, -inf }
 0x603   : > { %v2896_v54 = vpop.f32.mrf.mxu1  ;;  %v1292_v0 = vsel %vm862_vm1, %v4036_v61, -inf }
 0x609   : > { %v4019_v55 = vpop.f32.mrf.mxu1 }
 0x60a   : > { %v1470_v26 = vsel %vm3923_vm4, %v4019_v55, -inf }
 0x60b   : > { %v2910_v56 = vpop.f32.mrf.mxu1  ;;  %v1471_v27 = vsel %vm862_vm1, %v1470_v26, -inf }
 0x611   : > { %v1645_v57 = vpop.f32.mrf.mxu1 }
 0x612   : > { %v1649_v58 = vsel %vm3923_vm4, %v1645_v57, -inf }
 0x613   : > { %v2924_v59 = vpop.f32.mrf.mxu1  ;;  %v1650_v60 = vsel %vm862_vm1, %v1649_v58, -inf }
 0x614   : > { %1651 = vmax.xlane.f32.xlu0 %v1650_v60 }
 0x62a   : > { %1925 = vrot.lane.b32.xlu0 %v3906_v4, %s3515_s3 }
 0x62e   : > { %2019 = vrot.lane.b32.xlu0 %v3914_v5, %s3515_s3 }
 0x632   : > { %2017 = vrot.lane.b32.xlu0 %v3918_v6, %s3515_s3 }
 0x636   : > { %2108 = vrot.lane.b32.xlu0 %v3871_v49, %s3516_s12  ;;  %v1747_v49 = vpop.permute.xlu1 %1746 }
 0x63a   : > { %2106 = vrot.lane.b32.xlu0 %v3896_v63, %s3516_s12  ;;  %v1930_v63 = vpop.permute.xlu1 %1929 }
 0x63e   : > { %v1928_v11 = vpop.permute.xlu1 %1927 }
 0x659   : > { %1293 = vmax.xlane.f32.xlu0 %v1292_v0 }
 0x69d   : > { %v1652_v1 = vpop.xlane.xlu0 %1651 }
 0x69e   : > { %v1653_v2 = vsub.f32 %v1649_v58, %v1652_v1 }
 0x6a0   : > { %v1654_v3 = vmul.f32 1.442695, %v1653_v2 }
 0x6a1   : > { %v1926_v10 = vpop.permute.xlu0 %1925 }
 0x6a2   : > { %3172 = vpow2.f32 %v1654_v3 }
 0x6a5   : > { %v2020_v12 = vpop.permute.xlu0 %2019 }
 0x6a9   : > { %v2018_v13 = vpop.permute.xlu0 %2017 }
 0x6af   : > { %v4040_v9 = vpop.eup %3172 }
 0x6b0   : > { %2930 = vmatmul.mubr.msk.f32.vlgmr.msra.gmra.mxu1 %vm862_vm1, %v4040_v9  ;;  %v1656_v14 = vsel %vm862_vm1, %v4040_v9, 0.0 }
 0x6b1   : > { %2933 = vmatpush3.xpose.msk.msra.mxu1 %vm862_vm1, %v1751_v7  ;;  %2936 = vmatprep.mubr.msk.f32.mxu1 %vm3509_vm0, %v3508_v45 }
 0x6b2   : > { %2934 = vmatprep.subr.mxu1 %v3508_v45 }
 0x6b5   : > { %2935 = vmatpush3.xpose.msk.msra.mxu1 %vm862_vm1, %v1749_v8 }
 0x6b6   : > { %2946 = vmatprep.subr.mxu1 %v3508_v45 }
 0x6b8   : > { %2937 = vmatmul.mubr.msk.f32.vlgmr.msra.gmra.mxu1 %vm862_vm1, %v1747_v49 }
 0x6b9   : > { %2947 = vmatpush3.xpose.msk.msra.mxu1 %vm862_vm1, %v1930_v63  ;;  %2950 = vmatprep.mubr.msk.f32.mxu1 %vm3509_vm0, %v3508_v45 }
 0x6ba   : > { %2948 = vmatprep.subr.mxu1 %v3508_v45 }
 0x6bd   : > { %2949 = vmatpush3.xpose.msk.msra.mxu1 %vm862_vm1, %v1928_v11 }
 0x6be   : > { %2953 = vmatprep.subr.mxu1 %v3508_v45 }
 0x6c0   : > { %2951 = vmatmul.mubr.msk.f32.vlgmr.msra.gmra.mxu1 %vm862_vm1, %v1926_v10 }
 0x6c1   : > { %2954 = vmatpush3.msra.mxu1 %v2020_v12  ;;  %2957 = vmatprep.mubr.msk.f32.mxu1 %vm3509_vm0, %v3508_v45 }
 0x6c2   : > { %2955 = vmatprep.subr.mxu1 %v3508_v45 }
 0x6c3   : > { %2956 = vmatpush3.msra.mxu1 %v2018_v13 }
 0x6c4   : > { %2960 = vmatprep.subr.mxu1 %v3508_v45 }
 0x770   : > { %v4062_v15 = vpop.f32.mrf.mxu1 }
 0x772   : > { %v2931_v16 = vpop.f32.mrf.mxu1 }
 0x778   : > { %v1824_v17 = vpop.f32.mrf.mxu1 }
 0x779   : > { %v1828_v18 = vsel %vm3923_vm4, %v1824_v17, -inf }
 0x77a   : > { %v2938_v19 = vpop.f32.mrf.mxu1  ;;  %v1829_v20 = vsel %vm862_vm1, %v1828_v18, -inf }
 0x77b   : > { %1830 = vmax.xlane.f32.xlu0 %v1829_v20 }
 0x780   : > { %v2003_v21 = vpop.f32.mrf.mxu1 }
 0x781   : > { %v2007_v22 = vsel %vm3923_vm4, %v2003_v21, -inf }
 0x782   : > { %v2952_v24 = vpop.f32.mrf.mxu1  ;;  %v2008_v25 = vsel %vm862_vm1, %v2007_v22, -inf }
 0x783   : > { %2009 = vmax.xlane.f32.xlu1 %v2008_v25 }
 0x791   : > { %1303 = vrot.lane.b32.xlu0 %v3914_v5, %s3511_s2 }
 0x794   : > { %2104 = vrot.lane.b32.xlu1 %v3906_v4, %s3516_s12  ;;  %v2109_v4 = vpop.permute.xlu0 %2108 }
 0x795   : > { %1482 = vrot.lane.b32.xlu0 %v3914_v5, %s3512_s0 }
 0x798   : > { %v2107_v30 = vpop.permute.xlu0 %2106 }
 0x799   : > { %1480 = vrot.lane.b32.xlu0 %v3918_v6, %s3512_s0 }
 0x79c   : > { %v1294_v31 = vpop.xlane.xlu0 %1293 }
 0x79d   : > { %1838 = vrot.lane.b32.xlu0 %v3918_v6, %s3514_s17  ;;  %v1295_v42 = vsub.f32 %v4036_v61, %v1294_v31 }
 0x79f   : > { %v1296_v43 = vmul.f32 1.442695, %v1295_v42  ;;  %v2295_v42 = vld [vmem:[#allocation14 + $0x58] sm:$0xff] }
 0x7b8   : > { %1472 = vmax.xlane.f32.xlu1 %v1471_v27 }
 0x7c9   : > { %1301 = vrot.lane.b32.xlu1 %v3918_v6, %s3511_s2 }
 0x7cd   : > { %1840 = vrot.lane.b32.xlu1 %v3914_v5, %s3514_s17 }
 0x7d1   : > { %2198 = vrot.lane.b32.xlu1 %v3914_v5, %s3516_s12 }
 0x7f5   : > { %1118 = vadd.xlane.f32.xlu1 %v1117_v29 }
 0x804   : > { %v1831_v32 = vpop.xlane.xlu0 %1830 }
 0x805   : > { %v1832_v33 = vsub.f32 %v1828_v18, %v1831_v32 }
 0x807   : > { %v1833_v34 = vmul.f32 1.442695, %v1832_v33 }
 0x808   : > { %v1304_v35 = vpop.permute.xlu0 %1303 }
 0x809   : > { %3174 = vpow2.f32 %v1833_v34  ;;  %2898 = vmatpush3.msra.mxu0 %v1304_v35 }
 0x80a   : > { %2899 = vmatprep.subr.mxu0 %v3508_v45 }
 0x80c   : > { %v2010_v36 = vpop.xlane.xlu1 %2009  ;;  %v1483_v46 = vpop.permute.xlu0 %1482 }
 0x80d   : > { %v2011_v37 = vsub.f32 %v2007_v22, %v2010_v36 }
 0x80f   : > { %v2012_v38 = vmul.f32 1.442695, %v2011_v37 }
 0x810   : > { %v2105_v41 = vpop.permute.xlu1 %2104  ;;  %v1481_v53 = vpop.permute.xlu0 %1480 }
 0x811   : > { %3176 = vpow2.f32 %v2012_v38 }
 0x812   : > { %3178 = vpow2.f32 %v1296_v43  ;;  %v2293_v43 = vld [vmem:[#allocation14 + $0x48] sm:$0xff] }
 0x814   : > { %v1839_v56 = vpop.permute.xlu0 %1838 }
 0x816   : > { %v3175_v5 = vpop.eup %3174 }
 0x817   : > { %v1835_v39 = vsel %vm862_vm1, %v3175_v5, 0.0 }
 0x818   : > { %1836 = vadd.xlane.f32.xlu1 %v1835_v39  ;;  %v2299_v39 = vld [vmem:[#allocation14 + $0x78] sm:$0xff] }
 0x81e   : > { %v3177_v40 = vpop.eup %3176 }
 0x81f   : > { %2958 = vmatmul.mubr.msk.f32.vlgmr.msra.gmra.mxu1 %vm862_vm1, %v3177_v40  ;;  %v3179_v52 = vpop.eup %3178  ;;  %v2014_v12 = vsel %vm862_vm1, %v3177_v40, 0.0  ;;  %v2298_v40 = vld [vmem:[#allocation14 + $0x70] sm:$0xff] }
 0x820   : > { %2961 = vmatpush3.xpose.msk.msra.mxu1 %vm862_vm1, %v2109_v4  ;;  %2964 = vmatprep.mubr.msk.f32.mxu1 %vm3509_vm0, %v3508_v45  ;;  %v1298_v10 = vsel %vm862_vm1, %v3179_v52, 0.0 }
 0x821   : > { %2962 = vmatprep.subr.mxu1 %v3508_v45 }
 0x824   : > { %2963 = vmatpush3.xpose.msk.msra.mxu1 %vm862_vm1, %v2107_v30 }
 0x827   : > { %2965 = vmatmul.mubr.msk.f32.vlgmr.msra.gmra.mxu1 %vm862_vm1, %v2105_v41  ;;  %v2296_v41 = vld [vmem:[#allocation14 + $0x60] sm:$0xff] }
 0x841   : > { %v1473_v44 = vpop.xlane.xlu1 %1472 }
 0x842   : > { %v1474_v47 = vsub.f32 %v1470_v26, %v1473_v44  ;;  %v2292_v44 = vld [vmem:[#allocation14 + $0x40] sm:$0xff] }
 0x844   : > { %v1475_v48 = vmul.f32 1.442695, %v1474_v47  ;;  %v2290_v47 = vld [vmem:[#allocation14 + $0x30] sm:$0xff] }
 0x845   : > { %v1302_v50 = vpop.permute.xlu1 %1301 }
 0x846   : > { %3180 = vpow2.f32 %v1475_v48  ;;  %2900 = vmatpush3.msra.mxu0 %v1302_v50  ;;  %v2289_v48 = vld [vmem:[#allocation14 + $0x28] sm:$0xff]  ;;  %v2288_v50 = vld [vmem:[#allocation14 + $0x20] sm:$0xff] }
 0x847   : > { %2902 = vmatmul.mubr.msk.f32.vlgmr.msra.gmra.mxu0 %vm862_vm1, %v3179_v52  ;;  %2911 = vmatprep.subr.mxu0 %v3508_v45 }
 0x848   : > { %2912 = vmatpush3.msra.mxu0 %v1483_v46  ;;  %2915 = vmatprep.mubr.msk.f32.mxu0 %vm3509_vm0, %v3508_v45  ;;  %v2291_v46 = vld [vmem:[#allocation14 + $0x38] sm:$0xff] }
 0x849   : > { %2913 = vmatprep.subr.mxu0 %v3508_v45  ;;  %v1841_v54 = vpop.permute.xlu1 %1840 }
 0x84a   : > { %2914 = vmatpush3.msra.mxu0 %v1481_v53 }
 0x84b   : > { %2939 = vmatprep.subr.mxu0 %v3508_v45 }
 0x84d   : > { %v2199_v57 = vpop.permute.xlu1 %2198 }
 0x853   : > { %v3181_v55 = vpop.eup %3180 }
 0x854   : > { %2916 = vmatmul.mubr.msk.f32.vlgmr.msra.gmra.mxu0 %vm862_vm1, %v3181_v55  ;;  %v1477_v11 = vsel %vm862_vm1, %v3181_v55, 0.0 }
 0x855   : > { %2940 = vmatpush3.msra.mxu0 %v1841_v54  ;;  %2943 = vmatprep.mubr.msk.f32.mxu0 %vm3509_vm0, %v3508_v45 }
 0x856   : > { %2941 = vmatprep.subr.mxu0 %v3508_v45 }
 0x857   : > { %2942 = vmatpush3.msra.mxu0 %v1839_v56 }
 0x858   : > { %2944 = vmatmul.mubr.msk.f32.vlgmr.msra.gmra.mxu0 %vm862_vm1, %v3175_v5  ;;  %2967 = vmatprep.subr.mxu0 %v3508_v45 }
 0x859   : > { %2968 = vmatpush3.msra.mxu0 %v2199_v57  ;;  %2971 = vmatprep.mubr.msk.f32.mxu0 %vm3509_vm0, %v3508_v45 }
 0x85a   : > { %2969 = vmatprep.subr.mxu0 %v3508_v45 }
 0x87e   : > { %v1119_v19 = vpop.xlane.xlu1 %1118 }
 0x8a1   : > { %v1837_v26 = vpop.xlane.xlu1 %1836 }
 0x8df   : > { %v4117_v58 = vpop.f32.mrf.mxu1 }
 0x8e1   : > { %v2959_v59 = vpop.f32.mrf.mxu1 }
 0x8e2   : > { %v2287_v59 = vld [vmem:[#allocation14 + $0x18] sm:$0xff] }
 0x8e7   : > { %v2182_v60 = vpop.f32.mrf.mxu1 }
 0x8e8   : > { %v2186_v61 = vsel %vm3923_vm4, %v2182_v60, -inf  ;;  %v2286_v60 = vld [vmem:[#allocation14 + $0x10] sm:$0xff] }
 0x8e9   : > { %v2966_v0 = vpop.f32.mrf.mxu1  ;;  %v2187_v1 = vsel %vm862_vm1, %v2186_v61, -inf }
 0x8ea   : > { %2188 = vmax.xlane.f32.xlu0 %v2187_v1  ;;  %v2284_v0 = vld [vmem:[#allocation14] sm:$0xff] }
 0x900   : > { %2196 = vrot.lane.b32.xlu0 %v3918_v6, %s3516_s12  ;;  %v949_v6 = vsel %vm862_vm1, %v3946_v23, 0.0 }
 0x907   : > { %v1376_v2 = vpop.f32.mrf.mxu0 }
 0x909   : > { %v2903_v3 = vpop.f32.mrf.mxu0 }
 0x914   : > { %v1555_v7 = vpop.f32.mrf.mxu0 }
 0x916   : > { %v2917_v8 = vpop.f32.mrf.mxu0 }
 0x918   : > { %v1913_v49 = vpop.f32.mrf.mxu0 }
 0x91a   : > { %v2945_v63 = vpop.f32.mrf.mxu0 }
 0x91b   : > { %v2630_v63 = vld [vmem:[%s4303_s15] ss:$0 sm:$0xff]  ;;  %s3368_s15 = scalar_lea.vmem %s3367_s29, 256 }
 0x91f   : > { %1299 = vadd.xlane.f32.xlu0 %v1298_v10 }
 0x923   : > { %1478 = vadd.xlane.f32.xlu0 %v1477_v11 }
 0x927   : > { %1657 = vadd.xlane.f32.xlu0 %v1656_v14 }
 0x92b   : > { %2015 = vadd.xlane.f32.xlu0 %v2014_v12 }
 0x92f   : > { %950 = vadd.xlane.f32.xlu0 %v949_v6 }
 0x973   : > { %v2189_v13 = vpop.xlane.xlu0 %2188 }
 0x974   : > { %v2190_v16 = vsub.f32 %v2186_v61, %v2189_v13  ;;  %v2285_v61 = vld [vmem:[#allocation14 + $0x8] sm:$0xff] }
 0x976   : > { %v2191_v17 = vmul.f32 1.442695, %v2190_v16 }
 0x977   : > { %v2197_v18 = vpop.permute.xlu0 %2196 }
 0x978   : > { %3182 = vpow2.f32 %v2191_v17  ;;  %2970 = vmatpush3.msra.mxu0 %v2197_v18 }
 0x979   : > { %2974 = vmatprep.subr.mxu0 %v3508_v45  ;;  %3184 = vrcp.f32 %v1119_v19 }
 0x985   : > { %v3183_v20 = vpop.eup %3182 }
 0x986   : > { %2972 = vmatmul.mubr.msk.f32.vlgmr.msra.gmra.mxu0 %vm862_vm1, %v3183_v20  ;;  %v2193_v9 = vsel %vm862_vm1, %v3183_v20, 0.0  ;;  %v3185_v23 = vpop.eup %3184 }
 0x987   : > { %2194 = vadd.xlane.f32.xlu1 %v2193_v9  ;;  %3006 = vmatprep.mubr.msk.f32.mxu0 %vm3509_vm0, %v3508_v45  ;;  %v1202_v21 = vmul.f32 %v3185_v23, %v4017_v51 }
 0x988   : > { %2975 = vmatpush3.msra.mxu0 %v2299_v39 }
 0x989   : > { %2976 = vmatprep.subr.mxu0 %v3508_v45 }
 0x98a   : > { %2977 = vmatpush3.msra.mxu0 %v2298_v40 }
 0x98b   : > { %2978 = vmatprep.subr.mxu0 %v3508_v45 }
 0x998   : > { %1204 = vrot.lane.b32.xlu1 %v1202_v21, %s3516_s12  ;;  %s3362_s12 = scalar_lea.vmem %s2425_s20, 128 }
 0x999   : > { %p3363_p1 = scmp.ne.s32.totalorder %s2425_s20, %s3362_s12  ;;  %p3370_p4 = scmp.lt.s32.totalorder %s3368_s15, %s3362_s12 }
 0x99b   : > { %p3364_p13 = pnand %p3363_p1, %p4309_p10  ;;  %p3371_p12 = por %p3370_p4, %p3369_p11 }
 0x99d   : > { %p3365_p2 = pneg %p3364_p13 }
 0x99f   : > { %p3372_p3 = pnand %p3371_p12, %p3365_p2 }
 0x9a8   : > { %v1300_v22 = vpop.xlane.xlu0 %1299 }
 0x9a9   : > { %3186 = vrcp.f32 %v1300_v22  ;;  %v2632_v22 = vld [vmem:[%s4306_s4] ss:$0 sm:$0xff] }
 0x9ac   : > { %v1479_v24 = vpop.xlane.xlu0 %1478 }
 0x9ad   : > { %3188 = vrcp.f32 %v1479_v24 }
 0x9b0   : > { %v1658_v25 = vpop.xlane.xlu0 %1657 }
 0x9b1   : > { %3190 = vrcp.f32 %v1658_v25 }
 0x9b2   : > { %3192 = vrcp.f32 %v1837_v26 }
 0x9b4   : > { %v2016_v27 = vpop.xlane.xlu0 %2015 }
 0x9b5   : > { %3194 = vrcp.f32 %v2016_v27 }
 0x9b6   : > { %v3187_v4 = vpop.eup %3186 }
 0x9b7   : > { %v1381_v29 = vmul.f32 %v3187_v4, %v1376_v2 }
 0x9b8   : > { %v951_v30 = vpop.xlane.xlu0 %950 }
 0x9b9   : > { %3196 = vrcp.f32 %v951_v30  ;;  %1383 = vrot.lane.b32.xlu0 %v1381_v29, %s3515_s3 }
 0x9ba   : > { %v3189_v31 = vpop.eup %3188 }
 0x9bb   : > { %v1560_v51 = vmul.f32 %v3189_v31, %v1555_v7 }
 0x9bd   : > { %1562 = vrot.lane.b32.xlu1 %v1560_v51, %s3514_s17 }
 0x9be   : > { %v3191_v32 = vpop.eup %3190 }
 0x9bf   : > { %v1739_v33 = vmul.f32 %v3191_v32, %v4062_v15  ;;  %v3193_v34 = vpop.eup %3192  ;;  %v2297_v15 = vld [vmem:[#allocation14 + $0x68] sm:$0xff] }
 0x9c0   : > { %v1918_v36 = vmul.f32 %v3193_v34, %v1913_v49  ;;  %2979 = vmatpush3.msra.mxu0 %v2297_v15 }
 0x9c1   : > { %1741 = vrot.lane.b32.xlu1 %v1739_v33, %s3513_s23  ;;  %2980 = vmatprep.subr.mxu0 %v3508_v45  ;;  %s4307_s23 = sld [smem:[#allocation42_spill]] }
 0x9c2   : > { %v3195_v35 = vpop.eup %3194  ;;  %2981 = vmatpush3.msra.mxu0 %v2296_v41 }
 0x9c3   : > { %v2097_v37 = vmul.f32 %v3195_v35, %v4117_v58  ;;  %2982 = vmatprep.subr.mxu0 %v3508_v45 }
 0x9c4   : > { %2983 = vmatpush3.msra.mxu0 %v2295_v42 }
 0x9c5   : > { %2099 = vrot.lane.b32.xlu0 %v2097_v37, %s3511_s2  ;;  %1920 = vrot.lane.b32.xlu1 %v1918_v36, %s3512_s0 }
 0x9c6   : > { %v3197_v38 = vpop.eup %3196  ;;  %2984 = vmatprep.subr.mxu0 %v3508_v45 }
 0x9c7   : > { %v1026_v5 = vmul.f32 %v3197_v38, %v3965_v28  ;;  %v2294_v28 = vld [vmem:[#allocation14 + $0x50] sm:$0xff]  ;;  %s4308_s17 = smov %s4307_s23  ;;  %s2422_s3 = scalar_lea.hbm %s4307_s23, %s2635_s26 }
 0x9c8   : > { %2985 = vmatpush3.msra.mxu0 %v2294_v28 }
 0x9c9   : > { %1027 = vst.msk [vmem:[#allocation4] sm:$0xff] %vm862_vm1, %v1026_v5  ;;  %2986 = vmatprep.subr.mxu0 %v3508_v45 }
 0x9ca   : > { %2987 = vmatpush3.msra.mxu0 %v2293_v43 }
 0x9cb   : > { %2988 = vmatprep.subr.mxu0 %v3508_v45 }
 0x9cc   : > { %2989 = vmatpush3.msra.mxu0 %v2292_v44 }
 0x9cd   : > { %2990 = vmatprep.subr.mxu0 %v3508_v45 }
 0x9ce   : > { %2991 = vmatpush3.msra.mxu0 %v2291_v46 }
 0x9cf   : > { %2992 = vmatprep.subr.mxu0 %v3508_v45 }
 0x9d0   : > { %2993 = vmatpush3.msra.mxu0 %v2290_v47 }
 0x9d1   : > { %2994 = vmatprep.subr.mxu0 %v3508_v45 }
 0x9d2   : > { %2995 = vmatpush3.msra.mxu0 %v2289_v48 }
 0x9d3   : > { %2996 = vmatprep.subr.mxu0 %v3508_v45 }
 0x9d4   : > { %2997 = vmatpush3.msra.mxu0 %v2288_v50 }
 0x9d5   : > { %2998 = vmatprep.subr.mxu0 %v3508_v45 }
 0x9d6   : > { %2999 = vmatpush3.msra.mxu0 %v2287_v59 }
 0x9d7   : > { %3000 = vmatprep.subr.mxu0 %v3508_v45 }
 0x9d8   : > { %3001 = vmatpush3.msra.mxu0 %v2286_v60 }
 0x9d9   : > { %3002 = vmatprep.subr.mxu0 %v3508_v45 }
 0x9da   : > { %3003 = vmatpush3.msra.mxu0 %v2285_v61 }
 0x9db   : > { %3004 = vmatprep.subr.mxu0 %v3508_v45 }
 0x9dc   : > { %3005 = vmatpush3.msra.mxu0 %v2284_v0 }
 0xa10   : > { %v2195_v52 = vpop.xlane.xlu1 %2194 }
 0xa11   : > { %3198 = vrcp.f32 %v2195_v52 }
 0xa14   : > { %v1205_v53 = vpop.permute.xlu1 %1204 }
 0xa15   : > { %1208 = vst.msk [vmem:[#allocation4] sm:$0xff] %vm1207_vm5, %v1205_v53 }
 0xa1e   : > { %v3199_v1 = vpop.eup %3198 }
 0xa2b   : > { %v1384_v54 = vpop.permute.xlu0 %1383 }
 0xa2c   : > { %1387 = vst.msk [vmem:[#allocation4] sm:$0xff] %vm1386_vm6, %v1384_v54 }
 0xa2f   : > { %v1563_v55 = vpop.permute.xlu1 %1562 }
 0xa30   : > { %1566 = vst.msk [vmem:[#allocation4] sm:$0xff] %vm1565_vm7, %v1563_v55 }
 0xa33   : > { %v1742_v56 = vpop.permute.xlu1 %1741 }
 0xa34   : > { %1745 = vst.msk [vmem:[#allocation4] sm:$0xff] %vm1744_vm8, %v1742_v56 }
 0xa37   : > { %v2100_v57 = vpop.permute.xlu0 %2099  ;;  %v1921_v58 = vpop.permute.xlu1 %1920 }
 0xa38   : > { %1924 = vst.msk [vmem:[#allocation4] sm:$0xff] %vm1923_vm9, %v1921_v58 }
 0xa39   : > { %2103 = vst.msk [vmem:[#allocation4] sm:$0xff] %vm2102_vm10, %v2100_v57 }
 0xa46   : > { %v2271_v2 = vpop.f32.mrf.mxu0 }
 0xa47   : > { %v2276_v3 = vmul.f32 %v3199_v1, %v2271_v2 }
 0xa48   : > { %v2973_v7 = vpop.f32.mrf.mxu0 }
 0xa49   : > { %2278 = vrot.lane.b32.xlu1 %v2276_v3, %s3510_s18 }
 0xabb   : > { %v2279_v8 = vpop.permute.xlu1 %2278 }
 0xabc   : > { %2282 = vst.msk [vmem:[#allocation4] sm:$0xff] %vm2281_vm11, %v2279_v8 }
 0xac3   : > { %v2283_v49 = vld [vmem:[#allocation4] sm:$0xff] }
 0xac4   : > { %3007 = vmatmul.mubr.f32.vlgmr.msra.gmra.mxu0 %v2283_v49 }
 0xb84   : > { %v2373_v10 = vpop.f32.mrf.mxu0 }
 0xb85   : > { %v2374_v11 = vadd.f32 %v2630_v63, %v2373_v10 }
 0xb86   : > { %v3008_v45 = vpop.f32.mrf.mxu0 }
 0xb87   : > { %v2377_v14 = vadd.f32 %v2374_v11, %v3889_v62  ;;  %v2631_v62 = vld [vmem:[%s4305_s16] ss:$0 sm:$0xff] }
 0xb89   : > { %2378 = vadd.xlane.f32.xlu0 %v2377_v14  ;;  %v2380_v12 = vmul.f32 %v2377_v14, %v2377_v14 }
 0xb8b   : > { %2381 = vadd.xlane.f32.xlu1 %v2380_v12 }
 0xc12   : > { %v2379_v6 = vpop.xlane.xlu0 %2378 }
 0xc13   : > { %v2383_v13 = vmul.f32 0.0078125, %v2379_v6 }
 0xc14   : > { %v2382_v16 = vpop.xlane.xlu1 %2381 }
 0xc15   : > { %v2385_v17 = vmul.f32 %v2383_v13, %v2383_v13  ;;  %v2384_v18 = vmul.f32 0.0078125, %v2382_v16  ;;  %v2387_v9 = vsub.f32 %v2377_v14, %v2383_v13 }
 0xc17   : > { %v2386_v19 = vsub.f32 %v2384_v18, %v2385_v17 }
 0xc19   : > { %v2388_v20 = vadd.f32 1e-05, %v2386_v19 }
 0xc1b   : > { %3200 = vrsqrt.f32 %v2388_v20 }
 0xc28   : > { %v3201_v23 = vpop.eup %3200 }
 0xc29   : > { %v2390_v21 = vmul.f32 %v3201_v23, %v2387_v9 }
 0xc2b   : > { %v2398_v24 = vmul.f32 %v2631_v62, %v2390_v21 }
 0xc2d   : > { %v2406_v25 = vadd.f32 %v2632_v22, %v2398_v24 }
 0xc2f   : > { %2407 = vst [vmem:[%s3850_s6] sm:$0xff] %v2406_v25 }
 0xc30   : > { %3375 = shalt.err (!%p3372_p3)
}
 0xc31   : > { %s3376_s9 = scalar_lea.hbm %s2422_s3, 128  ;;  %s3380_s10 = scalar_lea.hbm %s4308_s17, 512 }
 0xc32   : > { %p3377_p9 = scmp.ne.s32.totalorder %s2422_s3, %s3376_s9  ;;  %p3381_p0 = scmp.lt.s32.totalorder %s2422_s3, %s4308_s17 }
 0xc33   : > { %p3382_p5 = scmp.lt.s32.totalorder %s3380_s10, %s3376_s9 }
 0xc34   : > { %p3378_p7 = pnand %p3377_p9, %p4309_p10 }
 0xc35   : > { %p3383_p6 = por %p3382_p5, %p3381_p0 }
 0xc36   : > { %p3379_p8 = pneg %p3378_p7 }
 0xc38   : > { %p3384_p1 = pnand %p3383_p6, %p3379_p8 }
 0xc3a   : > { %3387 = shalt.err (!%p3384_p1)
}
 0xc3b   : > { %3029 = dma.vmem_to_hbm [thread:$0]  (%p4309_p10), %s2425_s20, 128, %s2422_s3, %s2409_s27  }
 0xc3c PF: > { %s4310_s19 = sld [smem:[#allocation24_spill]]  ;;  %p3064_p13 = scmp.ge.s32.totalorder %s3498_s13, 2 }
 0xc3d   : > { %s4311_s16 = sld [smem:[#allocation32_spill]] }
 0xc42   : > { %s2436_s18 = sand.u32 1, %s4310_s19  }
 0xc43   : > { %p4312_p2 = scmp.ne.s32.totalorder %s4311_s16, 0  ;;  %s2437_s8 = scalar_lea.sflag [#allocation7], %s2436_s18 }
 0xc45   : > { %p3052_p11 = pnand %p3064_p13, %p4312_p2 }
 0xc47   : > { %p3053_p4 = pneg %p3052_p11 }
 0xc49   : > { %3453 = dma.done.wait (%p3053_p4), %s2437_s8, 128  }
 0xc4a   : > { %3455 = vsyncadd (%p3053_p4), %s2437_s8, 4294967168  ;;  %s33_s13 = sadd.s32 1, %s3498_s13   ;;  %s4313_s4 = sld [smem:[#allocation23_spill]] }
 0xc4b   : > { %p30_p12 = scmp.ge.s32.totalorder %s33_s13, 6   ;;  %s4314_s23 = sld [smem:[#allocation30_spill]] }
 0xc4c   : > { %s4315_s26 = sld [smem:[#allocation25_spill]]  ;;  %s4320_s21 = smov %s3462_s22 }
 0xc4d   : > { %s4316_s20 = sld [smem:[#allocation31_spill]]  ;;  %s4322_s24 = smov %s3474_s25 }
 0xc4e   : > { %s4317_s27 = sld [smem:[#allocation27_spill]]  ;;  %s4325_s28 = smov %s3494_s30 }
 0xc4f   : > { %s4318_s29 = sld [smem:[#allocation28_spill]] }
 0xc50   : > { %s4319_s2 = sld [smem:[#allocation29_spill]]  ;;  %s4321_s22 = smov %s4313_s4 }
 0xc52   : > { %s4323_s25 = smov %s4315_s26  ;;  %32 = sbr.rel (!%p30_p12) target bundleno = 24 (0x18), region = 146 }
 0xc53   : > { %s4324_s26 = smov %s4316_s20 }
 0xc56   : > { %s4326_s30 = smov %s4319_s2 }
 0xc57   :  { %2442 = vsyncpa [#allocation6], 1 }
 0xc58   :  { %2444 = vsyncpa [#allocation6 + $0x1], 1 }
 0xc59   :  { %2445 = vsyncpa [#allocation9], 1 }
 0xc5a   :  { %2447 = vsyncpa [#allocation9 + $0x1], 1 }
 0xc5b   :  { %2448 = vsyncpa [#allocation12], 1 }
 0xc5c   :  { %2449 = vsyncpa [#allocation15], 1 }
 0xc5d   :  { %2450 = vsyncpa [#allocation7], 1 }
 0xc5e   :  { %2452 = vsyncpa [#allocation7 + $0x1], 1 }

</bundles_post_ra>
